<compile_context>
chip_gen: v5e
topology: v5e:2x2
jax: 0.10.0
libtpu: 0.0.40
codegen_flags: <defaults>
</compile_context>

<pallas_src>
import functools
from dataclasses import dataclass

import jax
import jax.numpy as jnp
from jax.experimental import pallas as pl
from jax.experimental.pallas import tpu as pltpu


# ----------------------------- configuration ------------------------------

@dataclass
class EvoLinguaConfig:
    vocab_size: int = 64
    max_seq_len: int = 16
    embed_dim: int = 32
    num_layers: int = 2
    num_heads: int = 4
    head_dim: int = 8            # num_heads * head_dim == embed_dim
    latent_dim: int = 16         # MLA compressed KV latent
    num_routed_experts: int = 4
    top_k: int = 2
    moe_hidden: int = 64
    num_mtp_tokens: int = 2      # multi-token-prediction depth


# --------------------------- in-kernel helpers ------------------------------

def _mm(a, b):
    """bf16-in / f32-accumulate matmul (MXU)."""
    return jnp.dot(a.astype(jnp.bfloat16), b.astype(jnp.bfloat16),
                   preferred_element_type=jnp.float32)


def _mm_nt(a, b):
    """a @ b.T with bf16 inputs, f32 accumulation (no explicit transpose)."""
    return jax.lax.dot_general(
        a.astype(jnp.bfloat16), b.astype(jnp.bfloat16),
        dimension_numbers=(((1,), (1,)), ((), ())),
        preferred_element_type=jnp.float32)


def _layer_norm(x, gamma, beta, eps):
    mean = jnp.mean(x, axis=-1, keepdims=True)
    var = jnp.mean(jnp.square(x - mean), axis=-1, keepdims=True)
    return (x - mean) * jax.lax.rsqrt(var + eps) * gamma + beta


def _softmax_lastdim(x):
    x = x - jnp.max(x, axis=-1, keepdims=True)
    p = jnp.exp(x)
    return p * pl.reciprocal(jnp.sum(p, axis=-1, keepdims=True), approx=True)


def _silu(g):
    return g * (1.0 / (1.0 + jnp.exp(-g)))


def _topk_gates(probs, top_k):
    """Renormalized top-k gates (first-occurrence tie-break), no lax.top_k."""
    S, E = probs.shape
    col = jax.lax.broadcasted_iota(jnp.int32, (S, E), 1)
    remaining = probs
    selected = jnp.zeros((S, E), jnp.bool_)
    for _ in range(top_k):
        m = jnp.max(remaining, axis=-1, keepdims=True)
        idx = jnp.min(jnp.where(remaining >= m, col, E), axis=-1, keepdims=True)
        pick = col == idx
        selected = jnp.logical_or(selected, pick)
        remaining = jnp.where(pick, jnp.float32(-1.0), remaining)
    gates = jnp.where(selected, probs, 0.0)
    denom = jnp.sum(gates, axis=-1, keepdims=True)
    return gates * pl.reciprocal(denom, approx=True)


# ------------------------------ fused kernels -------------------------------

def _layer_kernel(x_ref, wq_ref, wdkv_ref, wuk_ref, wuv_ref, wo_ref,
                  n1g_ref, n1b_ref,
                  router_ref, ws1_ref, ws3_ref, ws2_ref,
                  we1_ref, we3_ref, we2_ref,
                  n2g_ref, n2b_ref,
                  o_ref, *, top_k, eps):
    """Fused transformer layer for one batch element: MLA + LN + MoE + LN."""
    x = x_ref[...]                            # (S, D) f32
    S, D = x.shape
    H, _, Dh = wq_ref.shape
    E = we1_ref.shape[0]
    scale = 1.0 / (Dh ** 0.5)

    # ---------------- Multi-Head Latent Attention (fused) ----------------
    # TODO(synk): decoupled RoPE key path of the published MLA is omitted;
    # this is plain compressed-KV latent attention.
    kv_lat = _mm(x, wdkv_ref[...])            # (S, L)
    row = jax.lax.broadcasted_iota(jnp.int32, (S, S), 0)
    col = jax.lax.broadcasted_iota(jnp.int32, (S, S), 1)
    causal = col <= row
    attn_out = jnp.zeros((S, D), jnp.float32)
    for h in range(H):                        # static loop, all in VMEM
        qh = _mm(x, wq_ref[h])                # (S, Dh)
        kh = _mm(kv_lat, wuk_ref[h])          # (S, Dh)
        vh = _mm(kv_lat, wuv_ref[h])          # (S, Dh)
        s = _mm_nt(qh, kh) * scale            # (S, S)
        s = jnp.where(causal, s, jnp.float32(-1e30))
        p = _softmax_lastdim(s)               # f32 softmax
        attn_out = attn_out + _mm(_mm(p, vh), wo_ref[h])   # (S, D)

    h1 = _layer_norm(x + attn_out, n1g_ref[...], n1b_ref[...], eps)

    # ----------------------------- DeepSeekMoE ---------------------------
    logits = _mm(h1, router_ref[...])         # (S, E)
    gates = _topk_gates(_softmax_lastdim(logits), top_k)   # (S, E) f32
    col_e = jax.lax.broadcasted_iota(jnp.int32, gates.shape, 1)

    def expert(w1, w3, w2):
        g = _mm(h1, w1)
        u = _mm(h1, w3)
        return _mm(_silu(g) * u, w2)          # SwiGLU, elementwise in f32

    moe = expert(ws1_ref[...], ws3_ref[...], ws2_ref[...])  # shared expert
    for e in range(E):
        # gate column extracted via mask+reduce (no lane slicing); stays f32.
        gate_e = jnp.sum(jnp.where(col_e == e, gates, 0.0),
                         axis=-1, keepdims=True)             # (S, 1)
        moe = moe + gate_e * expert(we1_ref[e], we3_ref[e], we2_ref[e])

    o_ref[...] = _layer_norm(h1 + moe, n2g_ref[...], n2b_ref[...], eps)


def _head_kernel(x_ref, fg_ref, fb_ref, wout_ref, proj_ref, mg_ref, mb_ref,
                 o_ref, *, eps):
    """Fused final LayerNorm + output head + all MTP depths."""
    x = x_ref[...]                            # (S, D)
    num_mtp = proj_ref.shape[0]
    wout = wout_ref[...]                      # (D, V) bf16 (loaded once)
    xn = _layer_norm(x, fg_ref[...], fb_ref[...], eps)
    o_ref[0] = _mm(xn, wout)                  # main logits (S, V)
    # TODO(synk): MultiTokenPrediction internals unspecified; implemented as
    # per-depth (projection -> LayerNorm -> shared output head) logits.
    for d in range(num_mtp):
        h = _mm(xn, proj_ref[d])
        hn = _layer_norm(h, mg_ref[d], mb_ref[d], eps)
        o_ref[d + 1] = _mm(hn, wout)


# ------------------------------ kernel wrappers ------------------------------

def _full2(arr):
    return pl.BlockSpec(arr.shape, lambda b: (0, 0))


def _full3(arr):
    return pl.BlockSpec(arr.shape, lambda b: (0, 0, 0))


def fused_layer(x_flat, layer, cfg, B, S):
    D = cfg.embed_dim
    H, Dh, L = cfg.num_heads, cfg.head_dim, cfg.latent_dim
    E, Hm = cfg.num_routed_experts, cfg.moe_hidden
    T = B * S
    a, m = layer["attention"], layer["moe"]

    args = (x_flat, a["wq"], a["w_dkv"], a["w_uk"], a["w_uv"], a["wo"],
            layer["norm1_g"], layer["norm1_b"],
            m["router"], m["shared_w1"], m["shared_w3"], m["shared_w2"],
            m["experts_w1"], m["experts_w3"], m["experts_w2"],
            layer["norm2_g"], layer["norm2_b"])

    macs_attn = H * D * Dh + D * L + 2 * L * H * Dh + H * Dh * D + 2 * S * H * Dh
    macs_moe = D * E + (1 + E) * 3 * D * Hm
    flops = 2 * T * (macs_attn + macs_moe)
    trans = T * S * H + T * E + T * Hm * (1 + E)
    bytes_accessed = sum(int(v.size) * v.dtype.itemsize for v in args) + T * D * 4

    in_specs = [pl.BlockSpec((S, D), lambda b: (b, 0))] + [
        _full3(v) if v.ndim == 3 else _full2(v) for v in args[1:]
    ]
    return pl.pallas_call(
        functools.partial(_layer_kernel, top_k=cfg.top_k, eps=1e-5),
        out_shape=jax.ShapeDtypeStruct((T, D), jnp.float32),
        grid=(B,),
        in_specs=in_specs,
        out_specs=pl.BlockSpec((S, D), lambda b: (b, 0)),
        compiler_params=pltpu.CompilerParams(
            dimension_semantics=("parallel",)),
        cost_estimate=pl.CostEstimate(flops=flops, transcendentals=trans,
                                      bytes_accessed=bytes_accessed),
    )(*args)


def fused_head(x_flat, params, cfg, B, S):
    D, V, M = cfg.embed_dim, cfg.vocab_size, cfg.num_mtp_tokens
    T = B * S
    args = (x_flat, params["final_norm_g"], params["final_norm_b"],
            params["output_head"], params["mtp_proj"],
            params["mtp_norm_g"], params["mtp_norm_b"])

    flops = 2 * T * ((1 + M) * D * V + M * D * D)
    bytes_accessed = (sum(int(v.size) * v.dtype.itemsize for v in args)
                      + (1 + M) * T * V * 4)

    in_specs = [pl.BlockSpec((S, D), lambda b: (b, 0))] + [
        _full3(v) if v.ndim == 3 else _full2(v) for v in args[1:]
    ]
    return pl.pallas_call(
        functools.partial(_head_kernel, eps=1e-5),
        out_shape=jax.ShapeDtypeStruct((1 + M, T, V), jnp.float32),
        grid=(B,),
        in_specs=in_specs,
        out_specs=pl.BlockSpec((1 + M, S, V), lambda b: (0, b, 0)),
        compiler_params=pltpu.CompilerParams(
            dimension_semantics=("parallel",)),
        cost_estimate=pl.CostEstimate(flops=flops, transcendentals=0,
                                      bytes_accessed=bytes_accessed),
    )(*args)


# --------------------------------- forward ----------------------------------

def forward(params, input_ids, cfg):
    B, S = input_ids.shape
    D, V = cfg.embed_dim, cfg.vocab_size
    T = B * S

    x = params["embedding"][input_ids] + params["pos_emb"][:, :S, :]
    x = x.reshape(T, D).astype(jnp.float32)

    # TODO(synk): fp8_autocast has no clean Pallas equivalent; the fused layer
    # kernels use bf16 MXU inputs with f32 accumulation instead.
    for layer in params["layers"]:
        x = fused_layer(x, layer, cfg, B, S)

    logits = fused_head(x, params, cfg, B, S)           # (1+M, T, V)
    main_output = logits[0].reshape(B, S, V)
    mtp_outputs = [logits[1 + d].reshape(B, S, V)
                   for d in range(cfg.num_mtp_tokens)]
    return main_output, mtp_outputs


# ------------------------------ parameter init ------------------------------

def init_params(key, cfg):
    keys = iter(jax.random.split(key, 256))

    def nrm(shape, dtype=jnp.bfloat16, scale=0.02):
        return (scale * jax.random.normal(next(keys), shape, jnp.float32)
                ).astype(dtype)

    D, H, Dh, L = cfg.embed_dim, cfg.num_heads, cfg.head_dim, cfg.latent_dim
    Hm, E = cfg.moe_hidden, cfg.num_routed_experts
    M, V = cfg.num_mtp_tokens, cfg.vocab_size

    layers = []
    for _ in range(cfg.num_layers):
        layers.append({
            "attention": {
                # per-head weights stacked on a leading axis (ref[h] in-kernel)
                "wq": nrm((H, D, Dh)),
                "w_dkv": nrm((D, L)),
                "w_uk": nrm((H, L, Dh)),
                "w_uv": nrm((H, L, Dh)),
                "wo": nrm((H, Dh, D)),
            },
            "moe": {
                "router": nrm((D, E)),
                "shared_w1": nrm((D, Hm)),
                "shared_w3": nrm((D, Hm)),
                "shared_w2": nrm((Hm, D)),
                # routed experts stacked on a leading axis (ref[e] in-kernel)
                "experts_w1": nrm((E, D, Hm)),
                "experts_w3": nrm((E, D, Hm)),
                "experts_w2": nrm((E, Hm, D)),
            },
            "norm1_g": jnp.ones((1, D), jnp.float32),
            "norm1_b": jnp.zeros((1, D), jnp.float32),
            "norm2_g": jnp.ones((1, D), jnp.float32),
            "norm2_b": jnp.zeros((1, D), jnp.float32),
        })

    return {
        "embedding": nrm((V, D), dtype=jnp.float32),
        "pos_emb": jnp.zeros((1, cfg.max_seq_len, D), jnp.float32),
        "layers": layers,
        "final_norm_g": jnp.ones((1, D), jnp.float32),
        "final_norm_b": jnp.zeros((1, D), jnp.float32),
        "output_head": nrm((D, V)),
        "mtp_proj": nrm((M, D, D)),
        "mtp_norm_g": jnp.ones((M, 1, D), jnp.float32),
        "mtp_norm_b": jnp.zeros((M, 1, D), jnp.float32),
    }


# ----------------------------------- main -----------------------------------

if __name__ == "__main__":
    cfg = EvoLinguaConfig()
    key = jax.random.PRNGKey(0)
    pkey, ikey = jax.random.split(key)

    params = init_params(pkey, cfg)
    input_ids = jax.random.randint(ikey, (2, 8), 0, cfg.vocab_size,
                                   dtype=jnp.int32)

    fwd = jax.jit(functools.partial(forward, cfg=cfg))
    main_out, mtp_outs = fwd(params, input_ids)
    jax.block_until_ready(main_out)
    for o in mtp_outs:
        jax.block_until_ready(o)

    assert main_out.shape == (2, 8, cfg.vocab_size)
    assert len(mtp_outs) == cfg.num_mtp_tokens
    assert all(o.shape == (2, 8, cfg.vocab_size) for o in mtp_outs)
    assert bool(jnp.all(jnp.isfinite(main_out)))
    assert all(bool(jnp.all(jnp.isfinite(o))) for o in mtp_outs)
    print("KERNEL_OK")
</pallas_src>

<mosaic_0001>
module attributes {stable_mosaic.version = 11 : i64} {
  func.func @_head_kernel(%arg0: i32, %arg1: memref<8x32xf32, #tpu.memory_space<vmem>>, %arg2: memref<1x32xf32, #tpu.memory_space<vmem>>, %arg3: memref<1x32xf32, #tpu.memory_space<vmem>>, %arg4: memref<32x64xbf16, #tpu.memory_space<vmem>>, %arg5: memref<2x32x32xbf16, #tpu.memory_space<vmem>>, %arg6: memref<2x1x32xf32, #tpu.memory_space<vmem>>, %arg7: memref<2x1x32xf32, #tpu.memory_space<vmem>>, %arg8: memref<3x8x64xf32, #tpu.memory_space<vmem>>) attributes {dimension_semantics = [#tpu.dimension_semantics<parallel>], iteration_bounds = array<i64: 2>, scalar_prefetch = 0 : i64, scratch_operands = 0 : i64, tpu.core_type = #tpu.core_type<tc>, window_params = [{transform_indices = @transform_0, window_bounds = array<i64: 8, 32>}, {pipeline_mode = #tpu.pipeline_mode<synchronous>, transform_indices = @transform_1, window_bounds = array<i64: 1, 32>}, {pipeline_mode = #tpu.pipeline_mode<synchronous>, transform_indices = @transform_2, window_bounds = array<i64: 1, 32>}, {pipeline_mode = #tpu.pipeline_mode<synchronous>, transform_indices = @transform_3, window_bounds = array<i64: 32, 64>}, {pipeline_mode = #tpu.pipeline_mode<synchronous>, transform_indices = @transform_4, window_bounds = array<i64: 2, 32, 32>}, {pipeline_mode = #tpu.pipeline_mode<synchronous>, transform_indices = @transform_5, window_bounds = array<i64: 2, 1, 32>}, {pipeline_mode = #tpu.pipeline_mode<synchronous>, transform_indices = @transform_6, window_bounds = array<i64: 2, 1, 32>}, {transform_indices = @transform_7, window_bounds = array<i64: 3, 8, 64>}]} {
    %c0 = arith.constant 0 : index
    %c0_0 = arith.constant 0 : index
    %0 = vector.load %arg1[%c0, %c0_0] : memref<8x32xf32, #tpu.memory_space<vmem>>, vector<8x32xf32>
    %c0_1 = arith.constant 0 : index
    %c0_2 = arith.constant 0 : index
    %1 = vector.load %arg4[%c0_1, %c0_2] : memref<32x64xbf16, #tpu.memory_space<vmem>>, vector<32x64xbf16>
    %c0_3 = arith.constant 0 : index
    %c0_4 = arith.constant 0 : index
    %2 = vector.load %arg2[%c0_3, %c0_4] : memref<1x32xf32, #tpu.memory_space<vmem>>, vector<1x32xf32>
    %c0_5 = arith.constant 0 : index
    %c0_6 = arith.constant 0 : index
    %3 = vector.load %arg3[%c0_5, %c0_6] : memref<1x32xf32, #tpu.memory_space<vmem>>, vector<1x32xf32>
    %cst = arith.constant dense<0.000000e+00> : vector<8xf32>
    %4 = vector.multi_reduction <add>, %0, %cst [1] : vector<8x32xf32> to vector<8xf32>
    %5 = vector.shape_cast %4 : vector<8xf32> to vector<8x1xf32>
    %cst_7 = arith.constant 3.200000e+01 : f32
    %6 = vector.broadcast %cst_7 : f32 to vector<8x1xf32>
    %7 = arith.divf %5, %6 : vector<8x1xf32>
    %8 = vector.broadcast %7 : vector<8x1xf32> to vector<8x32xf32>
    %9 = arith.subf %0, %8 : vector<8x32xf32>
    %10 = arith.mulf %9, %9 : vector<8x32xf32>
    %cst_8 = arith.constant dense<0.000000e+00> : vector<8xf32>
    %11 = vector.multi_reduction <add>, %10, %cst_8 [1] : vector<8x32xf32> to vector<8xf32>
    %12 = vector.shape_cast %11 : vector<8xf32> to vector<8x1xf32>
    %cst_9 = arith.constant 3.200000e+01 : f32
    %13 = vector.broadcast %cst_9 : f32 to vector<8x1xf32>
    %14 = arith.divf %12, %13 : vector<8x1xf32>
    %15 = vector.broadcast %7 : vector<8x1xf32> to vector<8x32xf32>
    %16 = arith.subf %0, %15 : vector<8x32xf32>
    %cst_10 = arith.constant 9.99999974E-6 : f32
    %17 = vector.broadcast %cst_10 : f32 to vector<8x1xf32>
    %18 = arith.addf %14, %17 : vector<8x1xf32>
    %19 = math.rsqrt %18 : vector<8x1xf32>
    %20 = vector.broadcast %19 : vector<8x1xf32> to vector<8x32xf32>
    %21 = arith.mulf %16, %20 : vector<8x32xf32>
    %22 = vector.broadcast %2 : vector<1x32xf32> to vector<8x32xf32>
    %23 = arith.mulf %21, %22 : vector<8x32xf32>
    %24 = vector.broadcast %3 : vector<1x32xf32> to vector<8x32xf32>
    %25 = arith.addf %23, %24 : vector<8x32xf32>
    %26 = arith.truncf %25 : vector<8x32xf32> to vector<8x32xbf16>
    %cst_11 = arith.constant dense<0.000000e+00> : vector<8x64xf32>
    %27 = tpu.matmul %26, %1, %cst_11 {dimension_numbers = #tpu.dot_dimension_numbers<[1], [0], [0], [1], [0, 0, 1, 1], [], []>} : vector<8x32xbf16>, vector<32x64xbf16>, vector<8x64xf32> -> vector<8x64xf32>
    %c0_12 = arith.constant 0 : index
    %c0_13 = arith.constant 0 : index
    %c0_14 = arith.constant 0 : index
    %28 = vector.load %arg8[%c0_12, %c0_13, %c0_14] : memref<3x8x64xf32, #tpu.memory_space<vmem>>, vector<1x8x64xf32>
    %29 = vector.shape_cast %28 : vector<1x8x64xf32> to vector<8x64xf32>
    %30 = vector.shape_cast %27 : vector<8x64xf32> to vector<1x8x64xf32>
    tpu.vector_store %arg8[%c0_12, %c0_13, %c0_14], %30 {strides = array<i32>} : memref<3x8x64xf32, #tpu.memory_space<vmem>>, vector<1x8x64xf32>,
    %c0_15 = arith.constant 0 : index
    %c0_16 = arith.constant 0 : index
    %c0_17 = arith.constant 0 : index
    %31 = vector.load %arg5[%c0_15, %c0_16, %c0_17] : memref<2x32x32xbf16, #tpu.memory_space<vmem>>, vector<1x32x32xbf16>
    %32 = vector.shape_cast %31 : vector<1x32x32xbf16> to vector<32x32xbf16>
    %33 = arith.truncf %25 : vector<8x32xf32> to vector<8x32xbf16>
    %cst_18 = arith.constant dense<0.000000e+00> : vector<8x32xf32>
    %34 = tpu.matmul %33, %32, %cst_18 {dimension_numbers = #tpu.dot_dimension_numbers<[1], [0], [0], [1], [0, 0, 1, 1], [], []>} : vector<8x32xbf16>, vector<32x32xbf16>, vector<8x32xf32> -> vector<8x32xf32>
    %c0_19 = arith.constant 0 : index
    %c0_20 = arith.constant 0 : index
    %c0_21 = arith.constant 0 : index
    %35 = vector.load %arg6[%c0_19, %c0_20, %c0_21] : memref<2x1x32xf32, #tpu.memory_space<vmem>>, vector<1x1x32xf32>
    %36 = vector.shape_cast %35 : vector<1x1x32xf32> to vector<1x32xf32>
    %c0_22 = arith.constant 0 : index
    %c0_23 = arith.constant 0 : index
    %c0_24 = arith.constant 0 : index
    %37 = vector.load %arg7[%c0_22, %c0_23, %c0_24] : memref<2x1x32xf32, #tpu.memory_space<vmem>>, vector<1x1x32xf32>
    %38 = vector.shape_cast %37 : vector<1x1x32xf32> to vector<1x32xf32>
    %cst_25 = arith.constant dense<0.000000e+00> : vector<8xf32>
    %39 = vector.multi_reduction <add>, %34, %cst_25 [1] : vector<8x32xf32> to vector<8xf32>
    %40 = vector.shape_cast %39 : vector<8xf32> to vector<8x1xf32>
    %cst_26 = arith.constant 3.200000e+01 : f32
    %41 = vector.broadcast %cst_26 : f32 to vector<8x1xf32>
    %42 = arith.divf %40, %41 : vector<8x1xf32>
    %43 = vector.broadcast %42 : vector<8x1xf32> to vector<8x32xf32>
    %44 = arith.subf %34, %43 : vector<8x32xf32>
    %45 = arith.mulf %44, %44 : vector<8x32xf32>
    %cst_27 = arith.constant dense<0.000000e+00> : vector<8xf32>
    %46 = vector.multi_reduction <add>, %45, %cst_27 [1] : vector<8x32xf32> to vector<8xf32>
    %47 = vector.shape_cast %46 : vector<8xf32> to vector<8x1xf32>
    %cst_28 = arith.constant 3.200000e+01 : f32
    %48 = vector.broadcast %cst_28 : f32 to vector<8x1xf32>
    %49 = arith.divf %47, %48 : vector<8x1xf32>
    %50 = vector.broadcast %42 : vector<8x1xf32> to vector<8x32xf32>
    %51 = arith.subf %34, %50 : vector<8x32xf32>
    %cst_29 = arith.constant 9.99999974E-6 : f32
    %52 = vector.broadcast %cst_29 : f32 to vector<8x1xf32>
    %53 = arith.addf %49, %52 : vector<8x1xf32>
    %54 = math.rsqrt %53 : vector<8x1xf32>
    %55 = vector.broadcast %54 : vector<8x1xf32> to vector<8x32xf32>
    %56 = arith.mulf %51, %55 : vector<8x32xf32>
    %57 = vector.broadcast %36 : vector<1x32xf32> to vector<8x32xf32>
    %58 = arith.mulf %56, %57 : vector<8x32xf32>
    %59 = vector.broadcast %38 : vector<1x32xf32> to vector<8x32xf32>
    %60 = arith.addf %58, %59 : vector<8x32xf32>
    %61 = arith.truncf %60 : vector<8x32xf32> to vector<8x32xbf16>
    %cst_30 = arith.constant dense<0.000000e+00> : vector<8x64xf32>
    %62 = tpu.matmul %61, %1, %cst_30 {dimension_numbers = #tpu.dot_dimension_numbers<[1], [0], [0], [1], [0, 0, 1, 1], [], []>} : vector<8x32xbf16>, vector<32x64xbf16>, vector<8x64xf32> -> vector<8x64xf32>
    %c1 = arith.constant 1 : index
    %c0_31 = arith.constant 0 : index
    %c0_32 = arith.constant 0 : index
    %63 = vector.load %arg8[%c1, %c0_31, %c0_32] : memref<3x8x64xf32, #tpu.memory_space<vmem>>, vector<1x8x64xf32>
    %64 = vector.shape_cast %63 : vector<1x8x64xf32> to vector<8x64xf32>
    %65 = vector.shape_cast %62 : vector<8x64xf32> to vector<1x8x64xf32>
    tpu.vector_store %arg8[%c1, %c0_31, %c0_32], %65 {strides = array<i32>} : memref<3x8x64xf32, #tpu.memory_space<vmem>>, vector<1x8x64xf32>,
    %c1_33 = arith.constant 1 : index
    %c0_34 = arith.constant 0 : index
    %c0_35 = arith.constant 0 : index
    %66 = vector.load %arg5[%c1_33, %c0_34, %c0_35] : memref<2x32x32xbf16, #tpu.memory_space<vmem>>, vector<1x32x32xbf16>
    %67 = vector.shape_cast %66 : vector<1x32x32xbf16> to vector<32x32xbf16>
    %68 = arith.truncf %25 : vector<8x32xf32> to vector<8x32xbf16>
    %cst_36 = arith.constant dense<0.000000e+00> : vector<8x32xf32>
    %69 = tpu.matmul %68, %67, %cst_36 {dimension_numbers = #tpu.dot_dimension_numbers<[1], [0], [0], [1], [0, 0, 1, 1], [], []>} : vector<8x32xbf16>, vector<32x32xbf16>, vector<8x32xf32> -> vector<8x32xf32>
    %c1_37 = arith.constant 1 : index
    %c0_38 = arith.constant 0 : index
    %c0_39 = arith.constant 0 : index
    %70 = vector.load %arg6[%c1_37, %c0_38, %c0_39] : memref<2x1x32xf32, #tpu.memory_space<vmem>>, vector<1x1x32xf32>
    %71 = vector.shape_cast %70 : vector<1x1x32xf32> to vector<1x32xf32>
    %c1_40 = arith.constant 1 : index
    %c0_41 = arith.constant 0 : index
    %c0_42 = arith.constant 0 : index
    %72 = vector.load %arg7[%c1_40, %c0_41, %c0_42] : memref<2x1x32xf32, #tpu.memory_space<vmem>>, vector<1x1x32xf32>
    %73 = vector.shape_cast %72 : vector<1x1x32xf32> to vector<1x32xf32>
    %cst_43 = arith.constant dense<0.000000e+00> : vector<8xf32>
    %74 = vector.multi_reduction <add>, %69, %cst_43 [1] : vector<8x32xf32> to vector<8xf32>
    %75 = vector.shape_cast %74 : vector<8xf32> to vector<8x1xf32>
    %cst_44 = arith.constant 3.200000e+01 : f32
    %76 = vector.broadcast %cst_44 : f32 to vector<8x1xf32>
    %77 = arith.divf %75, %76 : vector<8x1xf32>
    %78 = vector.broadcast %77 : vector<8x1xf32> to vector<8x32xf32>
    %79 = arith.subf %69, %78 : vector<8x32xf32>
    %80 = arith.mulf %79, %79 : vector<8x32xf32>
    %cst_45 = arith.constant dense<0.000000e+00> : vector<8xf32>
    %81 = vector.multi_reduction <add>, %80, %cst_45 [1] : vector<8x32xf32> to vector<8xf32>
    %82 = vector.shape_cast %81 : vector<8xf32> to vector<8x1xf32>
    %cst_46 = arith.constant 3.200000e+01 : f32
    %83 = vector.broadcast %cst_46 : f32 to vector<8x1xf32>
    %84 = arith.divf %82, %83 : vector<8x1xf32>
    %85 = vector.broadcast %77 : vector<8x1xf32> to vector<8x32xf32>
    %86 = arith.subf %69, %85 : vector<8x32xf32>
    %cst_47 = arith.constant 9.99999974E-6 : f32
    %87 = vector.broadcast %cst_47 : f32 to vector<8x1xf32>
    %88 = arith.addf %84, %87 : vector<8x1xf32>
    %89 = math.rsqrt %88 : vector<8x1xf32>
    %90 = vector.broadcast %89 : vector<8x1xf32> to vector<8x32xf32>
    %91 = arith.mulf %86, %90 : vector<8x32xf32>
    %92 = vector.broadcast %71 : vector<1x32xf32> to vector<8x32xf32>
    %93 = arith.mulf %91, %92 : vector<8x32xf32>
    %94 = vector.broadcast %73 : vector<1x32xf32> to vector<8x32xf32>
    %95 = arith.addf %93, %94 : vector<8x32xf32>
    %96 = arith.truncf %95 : vector<8x32xf32> to vector<8x32xbf16>
    %cst_48 = arith.constant dense<0.000000e+00> : vector<8x64xf32>
    %97 = tpu.matmul %96, %1, %cst_48 {dimension_numbers = #tpu.dot_dimension_numbers<[1], [0], [0], [1], [0, 0, 1, 1], [], []>} : vector<8x32xbf16>, vector<32x64xbf16>, vector<8x64xf32> -> vector<8x64xf32>
    %c2 = arith.constant 2 : index
    %c0_49 = arith.constant 0 : index
    %c0_50 = arith.constant 0 : index
    %98 = vector.load %arg8[%c2, %c0_49, %c0_50] : memref<3x8x64xf32, #tpu.memory_space<vmem>>, vector<1x8x64xf32>
    %99 = vector.shape_cast %98 : vector<1x8x64xf32> to vector<8x64xf32>
    %100 = vector.shape_cast %97 : vector<8x64xf32> to vector<1x8x64xf32>
    tpu.vector_store %arg8[%c2, %c0_49, %c0_50], %100 {strides = array<i32>} : memref<3x8x64xf32, #tpu.memory_space<vmem>>, vector<1x8x64xf32>,
    return
  }
  func.func @transform_0(%arg0: i32) -> (i32, i32) {
    %c0_i32 = arith.constant 0 : i32
    %c0_i32_0 = arith.constant 0 : i32
    return %arg0, %c0_i32 : i32, i32
  }
  func.func @transform_1(%arg0: i32) -> (i32, i32) {
    %c0_i32 = arith.constant 0 : i32
    %c0_i32_0 = arith.constant 0 : i32
    %c0_i32_1 = arith.constant 0 : i32
    return %c0_i32, %c0_i32_0 : i32, i32
  }
  func.func @transform_2(%arg0: i32) -> (i32, i32) {
    %c0_i32 = arith.constant 0 : i32
    %c0_i32_0 = arith.constant 0 : i32
    %c0_i32_1 = arith.constant 0 : i32
    return %c0_i32, %c0_i32_0 : i32, i32
  }
  func.func @transform_3(%arg0: i32) -> (i32, i32) {
    %c0_i32 = arith.constant 0 : i32
    %c0_i32_0 = arith.constant 0 : i32
    %c0_i32_1 = arith.constant 0 : i32
    return %c0_i32, %c0_i32_0 : i32, i32
  }
  func.func @transform_4(%arg0: i32) -> (i32, i32, i32) {
    %c0_i32 = arith.constant 0 : i32
    %c0_i32_0 = arith.constant 0 : i32
    %c0_i32_1 = arith.constant 0 : i32
    %c0_i32_2 = arith.constant 0 : i32
    return %c0_i32, %c0_i32_0, %c0_i32_1 : i32, i32, i32
  }
  func.func @transform_5(%arg0: i32) -> (i32, i32, i32) {
    %c0_i32 = arith.constant 0 : i32
    %c0_i32_0 = arith.constant 0 : i32
    %c0_i32_1 = arith.constant 0 : i32
    %c0_i32_2 = arith.constant 0 : i32
    return %c0_i32, %c0_i32_0, %c0_i32_1 : i32, i32, i32
  }
  func.func @transform_6(%arg0: i32) -> (i32, i32, i32) {
    %c0_i32 = arith.constant 0 : i32
    %c0_i32_0 = arith.constant 0 : i32
    %c0_i32_1 = arith.constant 0 : i32
    %c0_i32_2 = arith.constant 0 : i32
    return %c0_i32, %c0_i32_0, %c0_i32_1 : i32, i32, i32
  }
  func.func @transform_7(%arg0: i32) -> (i32, i32, i32) {
    %c0_i32 = arith.constant 0 : i32
    %c0_i32_0 = arith.constant 0 : i32
    %c0_i32_1 = arith.constant 0 : i32
    return %c0_i32, %arg0, %c0_i32_0 : i32, i32, i32
  }
}

module attributes {stable_mosaic.version = 11 : i64} {
  func.func @_layer_kernel(%arg0: i32, %arg1: memref<8x32xf32, #tpu.memory_space<vmem>>, %arg2: memref<4x32x8xbf16, #tpu.memory_space<vmem>>, %arg3: memref<32x16xbf16, #tpu.memory_space<vmem>>, %arg4: memref<4x16x8xbf16, #tpu.memory_space<vmem>>, %arg5: memref<4x16x8xbf16, #tpu.memory_space<vmem>>, %arg6: memref<4x8x32xbf16, #tpu.memory_space<vmem>>, %arg7: memref<1x32xf32, #tpu.memory_space<vmem>>, %arg8: memref<1x32xf32, #tpu.memory_space<vmem>>, %arg9: memref<32x4xbf16, #tpu.memory_space<vmem>>, %arg10: memref<32x64xbf16, #tpu.memory_space<vmem>>, %arg11: memref<32x64xbf16, #tpu.memory_space<vmem>>, %arg12: memref<64x32xbf16, #tpu.memory_space<vmem>>, %arg13: memref<4x32x64xbf16, #tpu.memory_space<vmem>>, %arg14: memref<4x32x64xbf16, #tpu.memory_space<vmem>>, %arg15: memref<4x64x32xbf16, #tpu.memory_space<vmem>>, %arg16: memref<1x32xf32, #tpu.memory_space<vmem>>, %arg17: memref<1x32xf32, #tpu.memory_space<vmem>>, %arg18: memref<8x32xf32, #tpu.memory_space<vmem>>) attributes {dimension_semantics = [#tpu.dimension_semantics<parallel>], iteration_bounds = array<i64: 2>, scalar_prefetch = 0 : i64, scratch_operands = 0 : i64, tpu.core_type = #tpu.core_type<tc>, window_params = [{transform_indices = @transform_0, window_bounds = array<i64: 8, 32>}, {pipeline_mode = #tpu.pipeline_mode<synchronous>, transform_indices = @transform_1, window_bounds = array<i64: 4, 32, 8>}, {pipeline_mode = #tpu.pipeline_mode<synchronous>, transform_indices = @transform_2, window_bounds = array<i64: 32, 16>}, {pipeline_mode = #tpu.pipeline_mode<synchronous>, transform_indices = @transform_3, window_bounds = array<i64: 4, 16, 8>}, {pipeline_mode = #tpu.pipeline_mode<synchronous>, transform_indices = @transform_4, window_bounds = array<i64: 4, 16, 8>}, {pipeline_mode = #tpu.pipeline_mode<synchronous>, transform_indices = @transform_5, window_bounds = array<i64: 4, 8, 32>}, {pipeline_mode = #tpu.pipeline_mode<synchronous>, transform_indices = @transform_6, window_bounds = array<i64: 1, 32>}, {pipeline_mode = #tpu.pipeline_mode<synchronous>, transform_indices = @transform_7, window_bounds = array<i64: 1, 32>}, {pipeline_mode = #tpu.pipeline_mode<synchronous>, transform_indices = @transform_8, window_bounds = array<i64: 32, 4>}, {pipeline_mode = #tpu.pipeline_mode<synchronous>, transform_indices = @transform_9, window_bounds = array<i64: 32, 64>}, {pipeline_mode = #tpu.pipeline_mode<synchronous>, transform_indices = @transform_10, window_bounds = array<i64: 32, 64>}, {pipeline_mode = #tpu.pipeline_mode<synchronous>, transform_indices = @transform_11, window_bounds = array<i64: 64, 32>}, {pipeline_mode = #tpu.pipeline_mode<synchronous>, transform_indices = @transform_12, window_bounds = array<i64: 4, 32, 64>}, {pipeline_mode = #tpu.pipeline_mode<synchronous>, transform_indices = @transform_13, window_bounds = array<i64: 4, 32, 64>}, {pipeline_mode = #tpu.pipeline_mode<synchronous>, transform_indices = @transform_14, window_bounds = array<i64: 4, 64, 32>}, {pipeline_mode = #tpu.pipeline_mode<synchronous>, transform_indices = @transform_15, window_bounds = array<i64: 1, 32>}, {pipeline_mode = #tpu.pipeline_mode<synchronous>, transform_indices = @transform_16, window_bounds = array<i64: 1, 32>}, {transform_indices = @transform_17, window_bounds = array<i64: 8, 32>}]} {
    %c0 = arith.constant 0 : index
    %c0_0 = arith.constant 0 : index
    %0 = vector.load %arg1[%c0, %c0_0] : memref<8x32xf32, #tpu.memory_space<vmem>>, vector<8x32xf32>
    %c0_1 = arith.constant 0 : index
    %c0_2 = arith.constant 0 : index
    %1 = vector.load %arg3[%c0_1, %c0_2] : memref<32x16xbf16, #tpu.memory_space<vmem>>, vector<32x16xbf16>
    %2 = arith.truncf %0 : vector<8x32xf32> to vector<8x32xbf16>
    %cst = arith.constant dense<0.000000e+00> : vector<8x16xf32>
    %3 = tpu.matmul %2, %1, %cst {dimension_numbers = #tpu.dot_dimension_numbers<[1], [0], [0], [1], [0, 0, 1, 1], [], []>} : vector<8x32xbf16>, vector<32x16xbf16>, vector<8x16xf32> -> vector<8x16xf32>
    %4 = tpu.iota {dimensions = array<i32: 0>} : vector<8x8xi32>
    %5 = tpu.iota {dimensions = array<i32: 1>} : vector<8x8xi32>
    %6 = arith.cmpi sle, %5, %4 : vector<8x8xi32>
    %cst_3 = arith.constant 0.000000e+00 : f32
    %7 = vector.broadcast %cst_3 : f32 to vector<8x32xf32>
    %c0_4 = arith.constant 0 : index
    %c0_5 = arith.constant 0 : index
    %c0_6 = arith.constant 0 : index
    %8 = vector.load %arg2[%c0_4, %c0_5, %c0_6] : memref<4x32x8xbf16, #tpu.memory_space<vmem>>, vector<1x32x8xbf16>
    %9 = vector.shape_cast %8 : vector<1x32x8xbf16> to vector<32x8xbf16>
    %10 = arith.truncf %0 : vector<8x32xf32> to vector<8x32xbf16>
    %cst_7 = arith.constant dense<0.000000e+00> : vector<8x8xf32>
    %11 = tpu.matmul %10, %9, %cst_7 {dimension_numbers = #tpu.dot_dimension_numbers<[1], [0], [0], [1], [0, 0, 1, 1], [], []>} : vector<8x32xbf16>, vector<32x8xbf16>, vector<8x8xf32> -> vector<8x8xf32>
    %c0_8 = arith.constant 0 : index
    %c0_9 = arith.constant 0 : index
    %c0_10 = arith.constant 0 : index
    %12 = vector.load %arg4[%c0_8, %c0_9, %c0_10] : memref<4x16x8xbf16, #tpu.memory_space<vmem>>, vector<1x16x8xbf16>
    %13 = vector.shape_cast %12 : vector<1x16x8xbf16> to vector<16x8xbf16>
    %14 = arith.truncf %3 : vector<8x16xf32> to vector<8x16xbf16>
    %cst_11 = arith.constant dense<0.000000e+00> : vector<8x8xf32>
    %15 = tpu.matmul %14, %13, %cst_11 {dimension_numbers = #tpu.dot_dimension_numbers<[1], [0], [0], [1], [0, 0, 1, 1], [], []>} : vector<8x16xbf16>, vector<16x8xbf16>, vector<8x8xf32> -> vector<8x8xf32>
    %c0_12 = arith.constant 0 : index
    %c0_13 = arith.constant 0 : index
    %c0_14 = arith.constant 0 : index
    %16 = vector.load %arg5[%c0_12, %c0_13, %c0_14] : memref<4x16x8xbf16, #tpu.memory_space<vmem>>, vector<1x16x8xbf16>
    %17 = vector.shape_cast %16 : vector<1x16x8xbf16> to vector<16x8xbf16>
    %18 = arith.truncf %3 : vector<8x16xf32> to vector<8x16xbf16>
    %cst_15 = arith.constant dense<0.000000e+00> : vector<8x8xf32>
    %19 = tpu.matmul %18, %17, %cst_15 {dimension_numbers = #tpu.dot_dimension_numbers<[1], [0], [0], [1], [0, 0, 1, 1], [], []>} : vector<8x16xbf16>, vector<16x8xbf16>, vector<8x8xf32> -> vector<8x8xf32>
    %20 = arith.truncf %11 : vector<8x8xf32> to vector<8x8xbf16>
    %21 = arith.truncf %15 : vector<8x8xf32> to vector<8x8xbf16>
    %cst_16 = arith.constant dense<0.000000e+00> : vector<8x8xf32>
    %22 = tpu.matmul %20, %21, %cst_16 {dimension_numbers = #tpu.dot_dimension_numbers<[1], [1], [0], [0], [0, 0, 1, 0], [], []>} : vector<8x8xbf16>, vector<8x8xbf16>, vector<8x8xf32> -> vector<8x8xf32>
    %cst_17 = arith.constant 0.353553385 : f32
    %23 = vector.broadcast %cst_17 : f32 to vector<8x8xf32>
    %24 = arith.mulf %22, %23 : vector<8x8xf32>
    %cst_18 = arith.constant -1.000000e+30 : f32
    %25 = vector.broadcast %cst_18 : f32 to vector<8x8xf32>
    %26 = arith.select %6, %24, %25 : vector<8x8xi1>, vector<8x8xf32>
    %cst_19 = arith.constant dense<0xFF800000> : vector<8xf32>
    %27 = vector.multi_reduction <maximumf>, %26, %cst_19 [1] : vector<8x8xf32> to vector<8xf32>
    %28 = vector.shape_cast %27 : vector<8xf32> to vector<8x1xf32>
    %29 = vector.broadcast %28 : vector<8x1xf32> to vector<8x8xf32>
    %30 = arith.subf %26, %29 : vector<8x8xf32>
    %31 = math.exp %30 : vector<8x8xf32>
    %cst_20 = arith.constant dense<0.000000e+00> : vector<8xf32>
    %32 = vector.multi_reduction <add>, %31, %cst_20 [1] : vector<8x8xf32> to vector<8xf32>
    %33 = vector.shape_cast %32 : vector<8xf32> to vector<8x1xf32>
    %34 = tpu.reciprocal %33 {approx = true} : vector<8x1xf32> -> vector<8x1xf32>
    %35 = vector.broadcast %34 : vector<8x1xf32> to vector<8x8xf32>
    %36 = arith.mulf %31, %35 : vector<8x8xf32>
    %37 = arith.truncf %36 : vector<8x8xf32> to vector<8x8xbf16>
    %38 = arith.truncf %19 : vector<8x8xf32> to vector<8x8xbf16>
    %cst_21 = arith.constant dense<0.000000e+00> : vector<8x8xf32>
    %39 = tpu.matmul %37, %38, %cst_21 {dimension_numbers = #tpu.dot_dimension_numbers<[1], [0], [0], [1], [0, 0, 1, 1], [], []>} : vector<8x8xbf16>, vector<8x8xbf16>, vector<8x8xf32> -> vector<8x8xf32>
    %c0_22 = arith.constant 0 : index
    %c0_23 = arith.constant 0 : index
    %c0_24 = arith.constant 0 : index
    %40 = vector.load %arg6[%c0_22, %c0_23, %c0_24] : memref<4x8x32xbf16, #tpu.memory_space<vmem>>, vector<1x8x32xbf16>
    %41 = vector.shape_cast %40 : vector<1x8x32xbf16> to vector<8x32xbf16>
    %42 = arith.truncf %39 : vector<8x8xf32> to vector<8x8xbf16>
    %cst_25 = arith.constant dense<0.000000e+00> : vector<8x32xf32>
    %43 = tpu.matmul %42, %41, %cst_25 {dimension_numbers = #tpu.dot_dimension_numbers<[1], [0], [0], [1], [0, 0, 1, 1], [], []>} : vector<8x8xbf16>, vector<8x32xbf16>, vector<8x32xf32> -> vector<8x32xf32>
    %44 = arith.addf %7, %43 : vector<8x32xf32>
    %c1 = arith.constant 1 : index
    %c0_26 = arith.constant 0 : index
    %c0_27 = arith.constant 0 : index
    %45 = vector.load %arg2[%c1, %c0_26, %c0_27] : memref<4x32x8xbf16, #tpu.memory_space<vmem>>, vector<1x32x8xbf16>
    %46 = vector.shape_cast %45 : vector<1x32x8xbf16> to vector<32x8xbf16>
    %47 = arith.truncf %0 : vector<8x32xf32> to vector<8x32xbf16>
    %cst_28 = arith.constant dense<0.000000e+00> : vector<8x8xf32>
    %48 = tpu.matmul %47, %46, %cst_28 {dimension_numbers = #tpu.dot_dimension_numbers<[1], [0], [0], [1], [0, 0, 1, 1], [], []>} : vector<8x32xbf16>, vector<32x8xbf16>, vector<8x8xf32> -> vector<8x8xf32>
    %c1_29 = arith.constant 1 : index
    %c0_30 = arith.constant 0 : index
    %c0_31 = arith.constant 0 : index
    %49 = vector.load %arg4[%c1_29, %c0_30, %c0_31] : memref<4x16x8xbf16, #tpu.memory_space<vmem>>, vector<1x16x8xbf16>
    %50 = vector.shape_cast %49 : vector<1x16x8xbf16> to vector<16x8xbf16>
    %51 = arith.truncf %3 : vector<8x16xf32> to vector<8x16xbf16>
    %cst_32 = arith.constant dense<0.000000e+00> : vector<8x8xf32>
    %52 = tpu.matmul %51, %50, %cst_32 {dimension_numbers = #tpu.dot_dimension_numbers<[1], [0], [0], [1], [0, 0, 1, 1], [], []>} : vector<8x16xbf16>, vector<16x8xbf16>, vector<8x8xf32> -> vector<8x8xf32>
    %c1_33 = arith.constant 1 : index
    %c0_34 = arith.constant 0 : index
    %c0_35 = arith.constant 0 : index
    %53 = vector.load %arg5[%c1_33, %c0_34, %c0_35] : memref<4x16x8xbf16, #tpu.memory_space<vmem>>, vector<1x16x8xbf16>
    %54 = vector.shape_cast %53 : vector<1x16x8xbf16> to vector<16x8xbf16>
    %55 = arith.truncf %3 : vector<8x16xf32> to vector<8x16xbf16>
    %cst_36 = arith.constant dense<0.000000e+00> : vector<8x8xf32>
    %56 = tpu.matmul %55, %54, %cst_36 {dimension_numbers = #tpu.dot_dimension_numbers<[1], [0], [0], [1], [0, 0, 1, 1], [], []>} : vector<8x16xbf16>, vector<16x8xbf16>, vector<8x8xf32> -> vector<8x8xf32>
    %57 = arith.truncf %48 : vector<8x8xf32> to vector<8x8xbf16>
    %58 = arith.truncf %52 : vector<8x8xf32> to vector<8x8xbf16>
    %cst_37 = arith.constant dense<0.000000e+00> : vector<8x8xf32>
    %59 = tpu.matmul %57, %58, %cst_37 {dimension_numbers = #tpu.dot_dimension_numbers<[1], [1], [0], [0], [0, 0, 1, 0], [], []>} : vector<8x8xbf16>, vector<8x8xbf16>, vector<8x8xf32> -> vector<8x8xf32>
    %cst_38 = arith.constant 0.353553385 : f32
    %60 = vector.broadcast %cst_38 : f32 to vector<8x8xf32>
    %61 = arith.mulf %59, %60 : vector<8x8xf32>
    %cst_39 = arith.constant -1.000000e+30 : f32
    %62 = vector.broadcast %cst_39 : f32 to vector<8x8xf32>
    %63 = arith.select %6, %61, %62 : vector<8x8xi1>, vector<8x8xf32>
    %cst_40 = arith.constant dense<0xFF800000> : vector<8xf32>
    %64 = vector.multi_reduction <maximumf>, %63, %cst_40 [1] : vector<8x8xf32> to vector<8xf32>
    %65 = vector.shape_cast %64 : vector<8xf32> to vector<8x1xf32>
    %66 = vector.broadcast %65 : vector<8x1xf32> to vector<8x8xf32>
    %67 = arith.subf %63, %66 : vector<8x8xf32>
    %68 = math.exp %67 : vector<8x8xf32>
    %cst_41 = arith.constant dense<0.000000e+00> : vector<8xf32>
    %69 = vector.multi_reduction <add>, %68, %cst_41 [1] : vector<8x8xf32> to vector<8xf32>
    %70 = vector.shape_cast %69 : vector<8xf32> to vector<8x1xf32>
    %71 = tpu.reciprocal %70 {approx = true} : vector<8x1xf32> -> vector<8x1xf32>
    %72 = vector.broadcast %71 : vector<8x1xf32> to vector<8x8xf32>
    %73 = arith.mulf %68, %72 : vector<8x8xf32>
    %74 = arith.truncf %73 : vector<8x8xf32> to vector<8x8xbf16>
    %75 = arith.truncf %56 : vector<8x8xf32> to vector<8x8xbf16>
    %cst_42 = arith.constant dense<0.000000e+00> : vector<8x8xf32>
    %76 = tpu.matmul %74, %75, %cst_42 {dimension_numbers = #tpu.dot_dimension_numbers<[1], [0], [0], [1], [0, 0, 1, 1], [], []>} : vector<8x8xbf16>, vector<8x8xbf16>, vector<8x8xf32> -> vector<8x8xf32>
    %c1_43 = arith.constant 1 : index
    %c0_44 = arith.constant 0 : index
    %c0_45 = arith.constant 0 : index
    %77 = vector.load %arg6[%c1_43, %c0_44, %c0_45] : memref<4x8x32xbf16, #tpu.memory_space<vmem>>, vector<1x8x32xbf16>
    %78 = vector.shape_cast %77 : vector<1x8x32xbf16> to vector<8x32xbf16>
    %79 = arith.truncf %76 : vector<8x8xf32> to vector<8x8xbf16>
    %cst_46 = arith.constant dense<0.000000e+00> : vector<8x32xf32>
    %80 = tpu.matmul %79, %78, %cst_46 {dimension_numbers = #tpu.dot_dimension_numbers<[1], [0], [0], [1], [0, 0, 1, 1], [], []>} : vector<8x8xbf16>, vector<8x32xbf16>, vector<8x32xf32> -> vector<8x32xf32>
    %81 = arith.addf %44, %80 : vector<8x32xf32>
    %c2 = arith.constant 2 : index
    %c0_47 = arith.constant 0 : index
    %c0_48 = arith.constant 0 : index
    %82 = vector.load %arg2[%c2, %c0_47, %c0_48] : memref<4x32x8xbf16, #tpu.memory_space<vmem>>, vector<1x32x8xbf16>
    %83 = vector.shape_cast %82 : vector<1x32x8xbf16> to vector<32x8xbf16>
    %84 = arith.truncf %0 : vector<8x32xf32> to vector<8x32xbf16>
    %cst_49 = arith.constant dense<0.000000e+00> : vector<8x8xf32>
    %85 = tpu.matmul %84, %83, %cst_49 {dimension_numbers = #tpu.dot_dimension_numbers<[1], [0], [0], [1], [0, 0, 1, 1], [], []>} : vector<8x32xbf16>, vector<32x8xbf16>, vector<8x8xf32> -> vector<8x8xf32>
    %c2_50 = arith.constant 2 : index
    %c0_51 = arith.constant 0 : index
    %c0_52 = arith.constant 0 : index
    %86 = vector.load %arg4[%c2_50, %c0_51, %c0_52] : memref<4x16x8xbf16, #tpu.memory_space<vmem>>, vector<1x16x8xbf16>
    %87 = vector.shape_cast %86 : vector<1x16x8xbf16> to vector<16x8xbf16>
    %88 = arith.truncf %3 : vector<8x16xf32> to vector<8x16xbf16>
    %cst_53 = arith.constant dense<0.000000e+00> : vector<8x8xf32>
    %89 = tpu.matmul %88, %87, %cst_53 {dimension_numbers = #tpu.dot_dimension_numbers<[1], [0], [0], [1], [0, 0, 1, 1], [], []>} : vector<8x16xbf16>, vector<16x8xbf16>, vector<8x8xf32> -> vector<8x8xf32>
    %c2_54 = arith.constant 2 : index
    %c0_55 = arith.constant 0 : index
    %c0_56 = arith.constant 0 : index
    %90 = vector.load %arg5[%c2_54, %c0_55, %c0_56] : memref<4x16x8xbf16, #tpu.memory_space<vmem>>, vector<1x16x8xbf16>
    %91 = vector.shape_cast %90 : vector<1x16x8xbf16> to vector<16x8xbf16>
    %92 = arith.truncf %3 : vector<8x16xf32> to vector<8x16xbf16>
    %cst_57 = arith.constant dense<0.000000e+00> : vector<8x8xf32>
    %93 = tpu.matmul %92, %91, %cst_57 {dimension_numbers = #tpu.dot_dimension_numbers<[1], [0], [0], [1], [0, 0, 1, 1], [], []>} : vector<8x16xbf16>, vector<16x8xbf16>, vector<8x8xf32> -> vector<8x8xf32>
    %94 = arith.truncf %85 : vector<8x8xf32> to vector<8x8xbf16>
    %95 = arith.truncf %89 : vector<8x8xf32> to vector<8x8xbf16>
    %cst_58 = arith.constant dense<0.000000e+00> : vector<8x8xf32>
    %96 = tpu.matmul %94, %95, %cst_58 {dimension_numbers = #tpu.dot_dimension_numbers<[1], [1], [0], [0], [0, 0, 1, 0], [], []>} : vector<8x8xbf16>, vector<8x8xbf16>, vector<8x8xf32> -> vector<8x8xf32>
    %cst_59 = arith.constant 0.353553385 : f32
    %97 = vector.broadcast %cst_59 : f32 to vector<8x8xf32>
    %98 = arith.mulf %96, %97 : vector<8x8xf32>
    %cst_60 = arith.constant -1.000000e+30 : f32
    %99 = vector.broadcast %cst_60 : f32 to vector<8x8xf32>
    %100 = arith.select %6, %98, %99 : vector<8x8xi1>, vector<8x8xf32>
    %cst_61 = arith.constant dense<0xFF800000> : vector<8xf32>
    %101 = vector.multi_reduction <maximumf>, %100, %cst_61 [1] : vector<8x8xf32> to vector<8xf32>
    %102 = vector.shape_cast %101 : vector<8xf32> to vector<8x1xf32>
    %103 = vector.broadcast %102 : vector<8x1xf32> to vector<8x8xf32>
    %104 = arith.subf %100, %103 : vector<8x8xf32>
    %105 = math.exp %104 : vector<8x8xf32>
    %cst_62 = arith.constant dense<0.000000e+00> : vector<8xf32>
    %106 = vector.multi_reduction <add>, %105, %cst_62 [1] : vector<8x8xf32> to vector<8xf32>
    %107 = vector.shape_cast %106 : vector<8xf32> to vector<8x1xf32>
    %108 = tpu.reciprocal %107 {approx = true} : vector<8x1xf32> -> vector<8x1xf32>
    %109 = vector.broadcast %108 : vector<8x1xf32> to vector<8x8xf32>
    %110 = arith.mulf %105, %109 : vector<8x8xf32>
    %111 = arith.truncf %110 : vector<8x8xf32> to vector<8x8xbf16>
    %112 = arith.truncf %93 : vector<8x8xf32> to vector<8x8xbf16>
    %cst_63 = arith.constant dense<0.000000e+00> : vector<8x8xf32>
    %113 = tpu.matmul %111, %112, %cst_63 {dimension_numbers = #tpu.dot_dimension_numbers<[1], [0], [0], [1], [0, 0, 1, 1], [], []>} : vector<8x8xbf16>, vector<8x8xbf16>, vector<8x8xf32> -> vector<8x8xf32>
    %c2_64 = arith.constant 2 : index
    %c0_65 = arith.constant 0 : index
    %c0_66 = arith.constant 0 : index
    %114 = vector.load %arg6[%c2_64, %c0_65, %c0_66] : memref<4x8x32xbf16, #tpu.memory_space<vmem>>, vector<1x8x32xbf16>
    %115 = vector.shape_cast %114 : vector<1x8x32xbf16> to vector<8x32xbf16>
    %116 = arith.truncf %113 : vector<8x8xf32> to vector<8x8xbf16>
    %cst_67 = arith.constant dense<0.000000e+00> : vector<8x32xf32>
    %117 = tpu.matmul %116, %115, %cst_67 {dimension_numbers = #tpu.dot_dimension_numbers<[1], [0], [0], [1], [0, 0, 1, 1], [], []>} : vector<8x8xbf16>, vector<8x32xbf16>, vector<8x32xf32> -> vector<8x32xf32>
    %118 = arith.addf %81, %117 : vector<8x32xf32>
    %c3 = arith.constant 3 : index
    %c0_68 = arith.constant 0 : index
    %c0_69 = arith.constant 0 : index
    %119 = vector.load %arg2[%c3, %c0_68, %c0_69] : memref<4x32x8xbf16, #tpu.memory_space<vmem>>, vector<1x32x8xbf16>
    %120 = vector.shape_cast %119 : vector<1x32x8xbf16> to vector<32x8xbf16>
    %121 = arith.truncf %0 : vector<8x32xf32> to vector<8x32xbf16>
    %cst_70 = arith.constant dense<0.000000e+00> : vector<8x8xf32>
    %122 = tpu.matmul %121, %120, %cst_70 {dimension_numbers = #tpu.dot_dimension_numbers<[1], [0], [0], [1], [0, 0, 1, 1], [], []>} : vector<8x32xbf16>, vector<32x8xbf16>, vector<8x8xf32> -> vector<8x8xf32>
    %c3_71 = arith.constant 3 : index
    %c0_72 = arith.constant 0 : index
    %c0_73 = arith.constant 0 : index
    %123 = vector.load %arg4[%c3_71, %c0_72, %c0_73] : memref<4x16x8xbf16, #tpu.memory_space<vmem>>, vector<1x16x8xbf16>
    %124 = vector.shape_cast %123 : vector<1x16x8xbf16> to vector<16x8xbf16>
    %125 = arith.truncf %3 : vector<8x16xf32> to vector<8x16xbf16>
    %cst_74 = arith.constant dense<0.000000e+00> : vector<8x8xf32>
    %126 = tpu.matmul %125, %124, %cst_74 {dimension_numbers = #tpu.dot_dimension_numbers<[1], [0], [0], [1], [0, 0, 1, 1], [], []>} : vector<8x16xbf16>, vector<16x8xbf16>, vector<8x8xf32> -> vector<8x8xf32>
    %c3_75 = arith.constant 3 : index
    %c0_76 = arith.constant 0 : index
    %c0_77 = arith.constant 0 : index
    %127 = vector.load %arg5[%c3_75, %c0_76, %c0_77] : memref<4x16x8xbf16, #tpu.memory_space<vmem>>, vector<1x16x8xbf16>
    %128 = vector.shape_cast %127 : vector<1x16x8xbf16> to vector<16x8xbf16>
    %129 = arith.truncf %3 : vector<8x16xf32> to vector<8x16xbf16>
    %cst_78 = arith.constant dense<0.000000e+00> : vector<8x8xf32>
    %130 = tpu.matmul %129, %128, %cst_78 {dimension_numbers = #tpu.dot_dimension_numbers<[1], [0], [0], [1], [0, 0, 1, 1], [], []>} : vector<8x16xbf16>, vector<16x8xbf16>, vector<8x8xf32> -> vector<8x8xf32>
    %131 = arith.truncf %122 : vector<8x8xf32> to vector<8x8xbf16>
    %132 = arith.truncf %126 : vector<8x8xf32> to vector<8x8xbf16>
    %cst_79 = arith.constant dense<0.000000e+00> : vector<8x8xf32>
    %133 = tpu.matmul %131, %132, %cst_79 {dimension_numbers = #tpu.dot_dimension_numbers<[1], [1], [0], [0], [0, 0, 1, 0], [], []>} : vector<8x8xbf16>, vector<8x8xbf16>, vector<8x8xf32> -> vector<8x8xf32>
    %cst_80 = arith.constant 0.353553385 : f32
    %134 = vector.broadcast %cst_80 : f32 to vector<8x8xf32>
    %135 = arith.mulf %133, %134 : vector<8x8xf32>
    %cst_81 = arith.constant -1.000000e+30 : f32
    %136 = vector.broadcast %cst_81 : f32 to vector<8x8xf32>
    %137 = arith.select %6, %135, %136 : vector<8x8xi1>, vector<8x8xf32>
    %cst_82 = arith.constant dense<0xFF800000> : vector<8xf32>
    %138 = vector.multi_reduction <maximumf>, %137, %cst_82 [1] : vector<8x8xf32> to vector<8xf32>
    %139 = vector.shape_cast %138 : vector<8xf32> to vector<8x1xf32>
    %140 = vector.broadcast %139 : vector<8x1xf32> to vector<8x8xf32>
    %141 = arith.subf %137, %140 : vector<8x8xf32>
    %142 = math.exp %141 : vector<8x8xf32>
    %cst_83 = arith.constant dense<0.000000e+00> : vector<8xf32>
    %143 = vector.multi_reduction <add>, %142, %cst_83 [1] : vector<8x8xf32> to vector<8xf32>
    %144 = vector.shape_cast %143 : vector<8xf32> to vector<8x1xf32>
    %145 = tpu.reciprocal %144 {approx = true} : vector<8x1xf32> -> vector<8x1xf32>
    %146 = vector.broadcast %145 : vector<8x1xf32> to vector<8x8xf32>
    %147 = arith.mulf %142, %146 : vector<8x8xf32>
    %148 = arith.truncf %147 : vector<8x8xf32> to vector<8x8xbf16>
    %149 = arith.truncf %130 : vector<8x8xf32> to vector<8x8xbf16>
    %cst_84 = arith.constant dense<0.000000e+00> : vector<8x8xf32>
    %150 = tpu.matmul %148, %149, %cst_84 {dimension_numbers = #tpu.dot_dimension_numbers<[1], [0], [0], [1], [0, 0, 1, 1], [], []>} : vector<8x8xbf16>, vector<8x8xbf16>, vector<8x8xf32> -> vector<8x8xf32>
    %c3_85 = arith.constant 3 : index
    %c0_86 = arith.constant 0 : index
    %c0_87 = arith.constant 0 : index
    %151 = vector.load %arg6[%c3_85, %c0_86, %c0_87] : memref<4x8x32xbf16, #tpu.memory_space<vmem>>, vector<1x8x32xbf16>
    %152 = vector.shape_cast %151 : vector<1x8x32xbf16> to vector<8x32xbf16>
    %153 = arith.truncf %150 : vector<8x8xf32> to vector<8x8xbf16>
    %cst_88 = arith.constant dense<0.000000e+00> : vector<8x32xf32>
    %154 = tpu.matmul %153, %152, %cst_88 {dimension_numbers = #tpu.dot_dimension_numbers<[1], [0], [0], [1], [0, 0, 1, 1], [], []>} : vector<8x8xbf16>, vector<8x32xbf16>, vector<8x32xf32> -> vector<8x32xf32>
    %155 = arith.addf %118, %154 : vector<8x32xf32>
    %156 = arith.addf %0, %155 : vector<8x32xf32>
    %c0_89 = arith.constant 0 : index
    %c0_90 = arith.constant 0 : index
    %157 = vector.load %arg7[%c0_89, %c0_90] : memref<1x32xf32, #tpu.memory_space<vmem>>, vector<1x32xf32>
    %c0_91 = arith.constant 0 : index
    %c0_92 = arith.constant 0 : index
    %158 = vector.load %arg8[%c0_91, %c0_92] : memref<1x32xf32, #tpu.memory_space<vmem>>, vector<1x32xf32>
    %cst_93 = arith.constant dense<0.000000e+00> : vector<8xf32>
    %159 = vector.multi_reduction <add>, %156, %cst_93 [1] : vector<8x32xf32> to vector<8xf32>
    %160 = vector.shape_cast %159 : vector<8xf32> to vector<8x1xf32>
    %cst_94 = arith.constant 3.200000e+01 : f32
    %161 = vector.broadcast %cst_94 : f32 to vector<8x1xf32>
    %162 = arith.divf %160, %161 : vector<8x1xf32>
    %163 = vector.broadcast %162 : vector<8x1xf32> to vector<8x32xf32>
    %164 = arith.subf %156, %163 : vector<8x32xf32>
    %165 = arith.mulf %164, %164 : vector<8x32xf32>
    %cst_95 = arith.constant dense<0.000000e+00> : vector<8xf32>
    %166 = vector.multi_reduction <add>, %165, %cst_95 [1] : vector<8x32xf32> to vector<8xf32>
    %167 = vector.shape_cast %166 : vector<8xf32> to vector<8x1xf32>
    %cst_96 = arith.constant 3.200000e+01 : f32
    %168 = vector.broadcast %cst_96 : f32 to vector<8x1xf32>
    %169 = arith.divf %167, %168 : vector<8x1xf32>
    %170 = vector.broadcast %162 : vector<8x1xf32> to vector<8x32xf32>
    %171 = arith.subf %156, %170 : vector<8x32xf32>
    %cst_97 = arith.constant 9.99999974E-6 : f32
    %172 = vector.broadcast %cst_97 : f32 to vector<8x1xf32>
    %173 = arith.addf %169, %172 : vector<8x1xf32>
    %174 = math.rsqrt %173 : vector<8x1xf32>
    %175 = vector.broadcast %174 : vector<8x1xf32> to vector<8x32xf32>
    %176 = arith.mulf %171, %175 : vector<8x32xf32>
    %177 = vector.broadcast %157 : vector<1x32xf32> to vector<8x32xf32>
    %178 = arith.mulf %176, %177 : vector<8x32xf32>
    %179 = vector.broadcast %158 : vector<1x32xf32> to vector<8x32xf32>
    %180 = arith.addf %178, %179 : vector<8x32xf32>
    %c0_98 = arith.constant 0 : index
    %c0_99 = arith.constant 0 : index
    %181 = vector.load %arg9[%c0_98, %c0_99] : memref<32x4xbf16, #tpu.memory_space<vmem>>, vector<32x4xbf16>
    %182 = arith.truncf %180 : vector<8x32xf32> to vector<8x32xbf16>
    %cst_100 = arith.constant dense<0.000000e+00> : vector<8x4xf32>
    %183 = tpu.matmul %182, %181, %cst_100 {dimension_numbers = #tpu.dot_dimension_numbers<[1], [0], [0], [1], [0, 0, 1, 1], [], []>} : vector<8x32xbf16>, vector<32x4xbf16>, vector<8x4xf32> -> vector<8x4xf32>
    %cst_101 = arith.constant dense<0xFF800000> : vector<8xf32>
    %184 = vector.multi_reduction <maximumf>, %183, %cst_101 [1] : vector<8x4xf32> to vector<8xf32>
    %185 = vector.shape_cast %184 : vector<8xf32> to vector<8x1xf32>
    %186 = vector.broadcast %185 : vector<8x1xf32> to vector<8x4xf32>
    %187 = arith.subf %183, %186 : vector<8x4xf32>
    %188 = math.exp %187 : vector<8x4xf32>
    %cst_102 = arith.constant dense<0.000000e+00> : vector<8xf32>
    %189 = vector.multi_reduction <add>, %188, %cst_102 [1] : vector<8x4xf32> to vector<8xf32>
    %190 = vector.shape_cast %189 : vector<8xf32> to vector<8x1xf32>
    %191 = tpu.reciprocal %190 {approx = true} : vector<8x1xf32> -> vector<8x1xf32>
    %192 = vector.broadcast %191 : vector<8x1xf32> to vector<8x4xf32>
    %193 = arith.mulf %188, %192 : vector<8x4xf32>
    %194 = tpu.iota {dimensions = array<i32: 1>} : vector<8x4xi32>
    %false = arith.constant false
    %195 = vector.broadcast %false : i1 to vector<8x4xi1>
    %cst_103 = arith.constant dense<0xFF800000> : vector<8xf32>
    %196 = vector.multi_reduction <maximumf>, %193, %cst_103 [1] : vector<8x4xf32> to vector<8xf32>
    %197 = vector.shape_cast %196 : vector<8xf32> to vector<8x1xf32>
    %198 = vector.broadcast %197 : vector<8x1xf32> to vector<8x4xf32>
    %199 = arith.cmpf oge, %193, %198 : vector<8x4xf32>
    %c4_i32 = arith.constant 4 : i32
    %200 = vector.broadcast %c4_i32 : i32 to vector<8x4xi32>
    %201 = arith.select %199, %194, %200 : vector<8x4xi1>, vector<8x4xi32>
    %cst_104 = arith.constant dense<2147483647> : vector<8xi32>
    %202 = vector.multi_reduction <minsi>, %201, %cst_104 [1] : vector<8x4xi32> to vector<8xi32>
    %203 = vector.shape_cast %202 : vector<8xi32> to vector<8x1xi32>
    %204 = vector.broadcast %203 : vector<8x1xi32> to vector<8x4xi32>
    %205 = arith.cmpi eq, %194, %204 : vector<8x4xi32>
    %206 = arith.ori %195, %205 : vector<8x4xi1>
    %cst_105 = arith.constant -1.000000e+00 : f32
    %207 = vector.broadcast %cst_105 : f32 to vector<8x4xf32>
    %208 = arith.select %205, %207, %193 : vector<8x4xi1>, vector<8x4xf32>
    %cst_106 = arith.constant dense<0xFF800000> : vector<8xf32>
    %209 = vector.multi_reduction <maximumf>, %208, %cst_106 [1] : vector<8x4xf32> to vector<8xf32>
    %210 = vector.shape_cast %209 : vector<8xf32> to vector<8x1xf32>
    %211 = vector.broadcast %210 : vector<8x1xf32> to vector<8x4xf32>
    %212 = arith.cmpf oge, %208, %211 : vector<8x4xf32>
    %c4_i32_107 = arith.constant 4 : i32
    %213 = vector.broadcast %c4_i32_107 : i32 to vector<8x4xi32>
    %214 = arith.select %212, %194, %213 : vector<8x4xi1>, vector<8x4xi32>
    %cst_108 = arith.constant dense<2147483647> : vector<8xi32>
    %215 = vector.multi_reduction <minsi>, %214, %cst_108 [1] : vector<8x4xi32> to vector<8xi32>
    %216 = vector.shape_cast %215 : vector<8xi32> to vector<8x1xi32>
    %217 = vector.broadcast %216 : vector<8x1xi32> to vector<8x4xi32>
    %218 = arith.cmpi eq, %194, %217 : vector<8x4xi32>
    %219 = arith.ori %206, %218 : vector<8x4xi1>
    %cst_109 = arith.constant 0.000000e+00 : f32
    %220 = vector.broadcast %cst_109 : f32 to vector<8x4xf32>
    %221 = arith.select %219, %193, %220 : vector<8x4xi1>, vector<8x4xf32>
    %cst_110 = arith.constant dense<0.000000e+00> : vector<8xf32>
    %222 = vector.multi_reduction <add>, %221, %cst_110 [1] : vector<8x4xf32> to vector<8xf32>
    %223 = vector.shape_cast %222 : vector<8xf32> to vector<8x1xf32>
    %224 = tpu.reciprocal %223 {approx = true} : vector<8x1xf32> -> vector<8x1xf32>
    %225 = vector.broadcast %224 : vector<8x1xf32> to vector<8x4xf32>
    %226 = arith.mulf %221, %225 : vector<8x4xf32>
    %227 = tpu.iota {dimensions = array<i32: 1>} : vector<8x4xi32>
    %c0_111 = arith.constant 0 : index
    %c0_112 = arith.constant 0 : index
    %228 = vector.load %arg10[%c0_111, %c0_112] : memref<32x64xbf16, #tpu.memory_space<vmem>>, vector<32x64xbf16>
    %c0_113 = arith.constant 0 : index
    %c0_114 = arith.constant 0 : index
    %229 = vector.load %arg11[%c0_113, %c0_114] : memref<32x64xbf16, #tpu.memory_space<vmem>>, vector<32x64xbf16>
    %c0_115 = arith.constant 0 : index
    %c0_116 = arith.constant 0 : index
    %230 = vector.load %arg12[%c0_115, %c0_116] : memref<64x32xbf16, #tpu.memory_space<vmem>>, vector<64x32xbf16>
    %231 = arith.truncf %180 : vector<8x32xf32> to vector<8x32xbf16>
    %cst_117 = arith.constant dense<0.000000e+00> : vector<8x64xf32>
    %232 = tpu.matmul %231, %228, %cst_117 {dimension_numbers = #tpu.dot_dimension_numbers<[1], [0], [0], [1], [0, 0, 1, 1], [], []>} : vector<8x32xbf16>, vector<32x64xbf16>, vector<8x64xf32> -> vector<8x64xf32>
    %233 = arith.truncf %180 : vector<8x32xf32> to vector<8x32xbf16>
    %cst_118 = arith.constant dense<0.000000e+00> : vector<8x64xf32>
    %234 = tpu.matmul %233, %229, %cst_118 {dimension_numbers = #tpu.dot_dimension_numbers<[1], [0], [0], [1], [0, 0, 1, 1], [], []>} : vector<8x32xbf16>, vector<32x64xbf16>, vector<8x64xf32> -> vector<8x64xf32>
    %cst_119 = arith.constant 0.000000e+00 : f32
    %235 = vector.broadcast %cst_119 : f32 to vector<8x64xf32>
    %236 = arith.subf %235, %232 : vector<8x64xf32>
    %237 = math.exp %236 : vector<8x64xf32>
    %cst_120 = arith.constant 1.000000e+00 : f32
    %238 = vector.broadcast %cst_120 : f32 to vector<8x64xf32>
    %239 = arith.addf %238, %237 : vector<8x64xf32>
    %cst_121 = arith.constant 1.000000e+00 : f32
    %240 = vector.broadcast %cst_121 : f32 to vector<8x64xf32>
    %241 = arith.divf %240, %239 : vector<8x64xf32>
    %242 = arith.mulf %232, %241 : vector<8x64xf32>
    %243 = arith.mulf %242, %234 : vector<8x64xf32>
    %244 = arith.truncf %243 : vector<8x64xf32> to vector<8x64xbf16>
    %cst_122 = arith.constant dense<0.000000e+00> : vector<8x32xf32>
    %245 = tpu.matmul %244, %230, %cst_122 {dimension_numbers = #tpu.dot_dimension_numbers<[1], [0], [0], [1], [0, 0, 1, 1], [], []>} : vector<8x64xbf16>, vector<64x32xbf16>, vector<8x32xf32> -> vector<8x32xf32>
    %c0_i32 = arith.constant 0 : i32
    %246 = vector.broadcast %c0_i32 : i32 to vector<8x4xi32>
    %247 = arith.cmpi eq, %227, %246 : vector<8x4xi32>
    %cst_123 = arith.constant 0.000000e+00 : f32
    %248 = vector.broadcast %cst_123 : f32 to vector<8x4xf32>
    %249 = arith.select %247, %226, %248 : vector<8x4xi1>, vector<8x4xf32>
    %cst_124 = arith.constant dense<0.000000e+00> : vector<8xf32>
    %250 = vector.multi_reduction <add>, %249, %cst_124 [1] : vector<8x4xf32> to vector<8xf32>
    %251 = vector.shape_cast %250 : vector<8xf32> to vector<8x1xf32>
    %c0_125 = arith.constant 0 : index
    %c0_126 = arith.constant 0 : index
    %c0_127 = arith.constant 0 : index
    %252 = vector.load %arg13[%c0_125, %c0_126, %c0_127] : memref<4x32x64xbf16, #tpu.memory_space<vmem>>, vector<1x32x64xbf16>
    %253 = vector.shape_cast %252 : vector<1x32x64xbf16> to vector<32x64xbf16>
    %c0_128 = arith.constant 0 : index
    %c0_129 = arith.constant 0 : index
    %c0_130 = arith.constant 0 : index
    %254 = vector.load %arg14[%c0_128, %c0_129, %c0_130] : memref<4x32x64xbf16, #tpu.memory_space<vmem>>, vector<1x32x64xbf16>
    %255 = vector.shape_cast %254 : vector<1x32x64xbf16> to vector<32x64xbf16>
    %c0_131 = arith.constant 0 : index
    %c0_132 = arith.constant 0 : index
    %c0_133 = arith.constant 0 : index
    %256 = vector.load %arg15[%c0_131, %c0_132, %c0_133] : memref<4x64x32xbf16, #tpu.memory_space<vmem>>, vector<1x64x32xbf16>
    %257 = vector.shape_cast %256 : vector<1x64x32xbf16> to vector<64x32xbf16>
    %258 = arith.truncf %180 : vector<8x32xf32> to vector<8x32xbf16>
    %cst_134 = arith.constant dense<0.000000e+00> : vector<8x64xf32>
    %259 = tpu.matmul %258, %253, %cst_134 {dimension_numbers = #tpu.dot_dimension_numbers<[1], [0], [0], [1], [0, 0, 1, 1], [], []>} : vector<8x32xbf16>, vector<32x64xbf16>, vector<8x64xf32> -> vector<8x64xf32>
    %260 = arith.truncf %180 : vector<8x32xf32> to vector<8x32xbf16>
    %cst_135 = arith.constant dense<0.000000e+00> : vector<8x64xf32>
    %261 = tpu.matmul %260, %255, %cst_135 {dimension_numbers = #tpu.dot_dimension_numbers<[1], [0], [0], [1], [0, 0, 1, 1], [], []>} : vector<8x32xbf16>, vector<32x64xbf16>, vector<8x64xf32> -> vector<8x64xf32>
    %cst_136 = arith.constant 0.000000e+00 : f32
    %262 = vector.broadcast %cst_136 : f32 to vector<8x64xf32>
    %263 = arith.subf %262, %259 : vector<8x64xf32>
    %264 = math.exp %263 : vector<8x64xf32>
    %cst_137 = arith.constant 1.000000e+00 : f32
    %265 = vector.broadcast %cst_137 : f32 to vector<8x64xf32>
    %266 = arith.addf %265, %264 : vector<8x64xf32>
    %cst_138 = arith.constant 1.000000e+00 : f32
    %267 = vector.broadcast %cst_138 : f32 to vector<8x64xf32>
    %268 = arith.divf %267, %266 : vector<8x64xf32>
    %269 = arith.mulf %259, %268 : vector<8x64xf32>
    %270 = arith.mulf %269, %261 : vector<8x64xf32>
    %271 = arith.truncf %270 : vector<8x64xf32> to vector<8x64xbf16>
    %cst_139 = arith.constant dense<0.000000e+00> : vector<8x32xf32>
    %272 = tpu.matmul %271, %257, %cst_139 {dimension_numbers = #tpu.dot_dimension_numbers<[1], [0], [0], [1], [0, 0, 1, 1], [], []>} : vector<8x64xbf16>, vector<64x32xbf16>, vector<8x32xf32> -> vector<8x32xf32>
    %273 = vector.broadcast %251 : vector<8x1xf32> to vector<8x32xf32>
    %274 = arith.mulf %273, %272 : vector<8x32xf32>
    %275 = arith.addf %245, %274 : vector<8x32xf32>
    %c1_i32 = arith.constant 1 : i32
    %276 = vector.broadcast %c1_i32 : i32 to vector<8x4xi32>
    %277 = arith.cmpi eq, %227, %276 : vector<8x4xi32>
    %cst_140 = arith.constant 0.000000e+00 : f32
    %278 = vector.broadcast %cst_140 : f32 to vector<8x4xf32>
    %279 = arith.select %277, %226, %278 : vector<8x4xi1>, vector<8x4xf32>
    %cst_141 = arith.constant dense<0.000000e+00> : vector<8xf32>
    %280 = vector.multi_reduction <add>, %279, %cst_141 [1] : vector<8x4xf32> to vector<8xf32>
    %281 = vector.shape_cast %280 : vector<8xf32> to vector<8x1xf32>
    %c1_142 = arith.constant 1 : index
    %c0_143 = arith.constant 0 : index
    %c0_144 = arith.constant 0 : index
    %282 = vector.load %arg13[%c1_142, %c0_143, %c0_144] : memref<4x32x64xbf16, #tpu.memory_space<vmem>>, vector<1x32x64xbf16>
    %283 = vector.shape_cast %282 : vector<1x32x64xbf16> to vector<32x64xbf16>
    %c1_145 = arith.constant 1 : index
    %c0_146 = arith.constant 0 : index
    %c0_147 = arith.constant 0 : index
    %284 = vector.load %arg14[%c1_145, %c0_146, %c0_147] : memref<4x32x64xbf16, #tpu.memory_space<vmem>>, vector<1x32x64xbf16>
    %285 = vector.shape_cast %284 : vector<1x32x64xbf16> to vector<32x64xbf16>
    %c1_148 = arith.constant 1 : index
    %c0_149 = arith.constant 0 : index
    %c0_150 = arith.constant 0 : index
    %286 = vector.load %arg15[%c1_148, %c0_149, %c0_150] : memref<4x64x32xbf16, #tpu.memory_space<vmem>>, vector<1x64x32xbf16>
    %287 = vector.shape_cast %286 : vector<1x64x32xbf16> to vector<64x32xbf16>
    %288 = arith.truncf %180 : vector<8x32xf32> to vector<8x32xbf16>
    %cst_151 = arith.constant dense<0.000000e+00> : vector<8x64xf32>
    %289 = tpu.matmul %288, %283, %cst_151 {dimension_numbers = #tpu.dot_dimension_numbers<[1], [0], [0], [1], [0, 0, 1, 1], [], []>} : vector<8x32xbf16>, vector<32x64xbf16>, vector<8x64xf32> -> vector<8x64xf32>
    %290 = arith.truncf %180 : vector<8x32xf32> to vector<8x32xbf16>
    %cst_152 = arith.constant dense<0.000000e+00> : vector<8x64xf32>
    %291 = tpu.matmul %290, %285, %cst_152 {dimension_numbers = #tpu.dot_dimension_numbers<[1], [0], [0], [1], [0, 0, 1, 1], [], []>} : vector<8x32xbf16>, vector<32x64xbf16>, vector<8x64xf32> -> vector<8x64xf32>
    %cst_153 = arith.constant 0.000000e+00 : f32
    %292 = vector.broadcast %cst_153 : f32 to vector<8x64xf32>
    %293 = arith.subf %292, %289 : vector<8x64xf32>
    %294 = math.exp %293 : vector<8x64xf32>
    %cst_154 = arith.constant 1.000000e+00 : f32
    %295 = vector.broadcast %cst_154 : f32 to vector<8x64xf32>
    %296 = arith.addf %295, %294 : vector<8x64xf32>
    %cst_155 = arith.constant 1.000000e+00 : f32
    %297 = vector.broadcast %cst_155 : f32 to vector<8x64xf32>
    %298 = arith.divf %297, %296 : vector<8x64xf32>
    %299 = arith.mulf %289, %298 : vector<8x64xf32>
    %300 = arith.mulf %299, %291 : vector<8x64xf32>
    %301 = arith.truncf %300 : vector<8x64xf32> to vector<8x64xbf16>
    %cst_156 = arith.constant dense<0.000000e+00> : vector<8x32xf32>
    %302 = tpu.matmul %301, %287, %cst_156 {dimension_numbers = #tpu.dot_dimension_numbers<[1], [0], [0], [1], [0, 0, 1, 1], [], []>} : vector<8x64xbf16>, vector<64x32xbf16>, vector<8x32xf32> -> vector<8x32xf32>
    %303 = vector.broadcast %281 : vector<8x1xf32> to vector<8x32xf32>
    %304 = arith.mulf %303, %302 : vector<8x32xf32>
    %305 = arith.addf %275, %304 : vector<8x32xf32>
    %c2_i32 = arith.constant 2 : i32
    %306 = vector.broadcast %c2_i32 : i32 to vector<8x4xi32>
    %307 = arith.cmpi eq, %227, %306 : vector<8x4xi32>
    %cst_157 = arith.constant 0.000000e+00 : f32
    %308 = vector.broadcast %cst_157 : f32 to vector<8x4xf32>
    %309 = arith.select %307, %226, %308 : vector<8x4xi1>, vector<8x4xf32>
    %cst_158 = arith.constant dense<0.000000e+00> : vector<8xf32>
    %310 = vector.multi_reduction <add>, %309, %cst_158 [1] : vector<8x4xf32> to vector<8xf32>
    %311 = vector.shape_cast %310 : vector<8xf32> to vector<8x1xf32>
    %c2_159 = arith.constant 2 : index
    %c0_160 = arith.constant 0 : index
    %c0_161 = arith.constant 0 : index
    %312 = vector.load %arg13[%c2_159, %c0_160, %c0_161] : memref<4x32x64xbf16, #tpu.memory_space<vmem>>, vector<1x32x64xbf16>
    %313 = vector.shape_cast %312 : vector<1x32x64xbf16> to vector<32x64xbf16>
    %c2_162 = arith.constant 2 : index
    %c0_163 = arith.constant 0 : index
    %c0_164 = arith.constant 0 : index
    %314 = vector.load %arg14[%c2_162, %c0_163, %c0_164] : memref<4x32x64xbf16, #tpu.memory_space<vmem>>, vector<1x32x64xbf16>
    %315 = vector.shape_cast %314 : vector<1x32x64xbf16> to vector<32x64xbf16>
    %c2_165 = arith.constant 2 : index
    %c0_166 = arith.constant 0 : index
    %c0_167 = arith.constant 0 : index
    %316 = vector.load %arg15[%c2_165, %c0_166, %c0_167] : memref<4x64x32xbf16, #tpu.memory_space<vmem>>, vector<1x64x32xbf16>
    %317 = vector.shape_cast %316 : vector<1x64x32xbf16> to vector<64x32xbf16>
    %318 = arith.truncf %180 : vector<8x32xf32> to vector<8x32xbf16>
    %cst_168 = arith.constant dense<0.000000e+00> : vector<8x64xf32>
    %319 = tpu.matmul %318, %313, %cst_168 {dimension_numbers = #tpu.dot_dimension_numbers<[1], [0], [0], [1], [0, 0, 1, 1], [], []>} : vector<8x32xbf16>, vector<32x64xbf16>, vector<8x64xf32> -> vector<8x64xf32>
    %320 = arith.truncf %180 : vector<8x32xf32> to vector<8x32xbf16>
    %cst_169 = arith.constant dense<0.000000e+00> : vector<8x64xf32>
    %321 = tpu.matmul %320, %315, %cst_169 {dimension_numbers = #tpu.dot_dimension_numbers<[1], [0], [0], [1], [0, 0, 1, 1], [], []>} : vector<8x32xbf16>, vector<32x64xbf16>, vector<8x64xf32> -> vector<8x64xf32>
    %cst_170 = arith.constant 0.000000e+00 : f32
    %322 = vector.broadcast %cst_170 : f32 to vector<8x64xf32>
    %323 = arith.subf %322, %319 : vector<8x64xf32>
    %324 = math.exp %323 : vector<8x64xf32>
    %cst_171 = arith.constant 1.000000e+00 : f32
    %325 = vector.broadcast %cst_171 : f32 to vector<8x64xf32>
    %326 = arith.addf %325, %324 : vector<8x64xf32>
    %cst_172 = arith.constant 1.000000e+00 : f32
    %327 = vector.broadcast %cst_172 : f32 to vector<8x64xf32>
    %328 = arith.divf %327, %326 : vector<8x64xf32>
    %329 = arith.mulf %319, %328 : vector<8x64xf32>
    %330 = arith.mulf %329, %321 : vector<8x64xf32>
    %331 = arith.truncf %330 : vector<8x64xf32> to vector<8x64xbf16>
    %cst_173 = arith.constant dense<0.000000e+00> : vector<8x32xf32>
    %332 = tpu.matmul %331, %317, %cst_173 {dimension_numbers = #tpu.dot_dimension_numbers<[1], [0], [0], [1], [0, 0, 1, 1], [], []>} : vector<8x64xbf16>, vector<64x32xbf16>, vector<8x32xf32> -> vector<8x32xf32>
    %333 = vector.broadcast %311 : vector<8x1xf32> to vector<8x32xf32>
    %334 = arith.mulf %333, %332 : vector<8x32xf32>
    %335 = arith.addf %305, %334 : vector<8x32xf32>
    %c3_i32 = arith.constant 3 : i32
    %336 = vector.broadcast %c3_i32 : i32 to vector<8x4xi32>
    %337 = arith.cmpi eq, %227, %336 : vector<8x4xi32>
    %cst_174 = arith.constant 0.000000e+00 : f32
    %338 = vector.broadcast %cst_174 : f32 to vector<8x4xf32>
    %339 = arith.select %337, %226, %338 : vector<8x4xi1>, vector<8x4xf32>
    %cst_175 = arith.constant dense<0.000000e+00> : vector<8xf32>
    %340 = vector.multi_reduction <add>, %339, %cst_175 [1] : vector<8x4xf32> to vector<8xf32>
    %341 = vector.shape_cast %340 : vector<8xf32> to vector<8x1xf32>
    %c3_176 = arith.constant 3 : index
    %c0_177 = arith.constant 0 : index
    %c0_178 = arith.constant 0 : index
    %342 = vector.load %arg13[%c3_176, %c0_177, %c0_178] : memref<4x32x64xbf16, #tpu.memory_space<vmem>>, vector<1x32x64xbf16>
    %343 = vector.shape_cast %342 : vector<1x32x64xbf16> to vector<32x64xbf16>
    %c3_179 = arith.constant 3 : index
    %c0_180 = arith.constant 0 : index
    %c0_181 = arith.constant 0 : index
    %344 = vector.load %arg14[%c3_179, %c0_180, %c0_181] : memref<4x32x64xbf16, #tpu.memory_space<vmem>>, vector<1x32x64xbf16>
    %345 = vector.shape_cast %344 : vector<1x32x64xbf16> to vector<32x64xbf16>
    %c3_182 = arith.constant 3 : index
    %c0_183 = arith.constant 0 : index
    %c0_184 = arith.constant 0 : index
    %346 = vector.load %arg15[%c3_182, %c0_183, %c0_184] : memref<4x64x32xbf16, #tpu.memory_space<vmem>>, vector<1x64x32xbf16>
    %347 = vector.shape_cast %346 : vector<1x64x32xbf16> to vector<64x32xbf16>
    %348 = arith.truncf %180 : vector<8x32xf32> to vector<8x32xbf16>
    %cst_185 = arith.constant dense<0.000000e+00> : vector<8x64xf32>
    %349 = tpu.matmul %348, %343, %cst_185 {dimension_numbers = #tpu.dot_dimension_numbers<[1], [0], [0], [1], [0, 0, 1, 1], [], []>} : vector<8x32xbf16>, vector<32x64xbf16>, vector<8x64xf32> -> vector<8x64xf32>
    %350 = arith.truncf %180 : vector<8x32xf32> to vector<8x32xbf16>
    %cst_186 = arith.constant dense<0.000000e+00> : vector<8x64xf32>
    %351 = tpu.matmul %350, %345, %cst_186 {dimension_numbers = #tpu.dot_dimension_numbers<[1], [0], [0], [1], [0, 0, 1, 1], [], []>} : vector<8x32xbf16>, vector<32x64xbf16>, vector<8x64xf32> -> vector<8x64xf32>
    %cst_187 = arith.constant 0.000000e+00 : f32
    %352 = vector.broadcast %cst_187 : f32 to vector<8x64xf32>
    %353 = arith.subf %352, %349 : vector<8x64xf32>
    %354 = math.exp %353 : vector<8x64xf32>
    %cst_188 = arith.constant 1.000000e+00 : f32
    %355 = vector.broadcast %cst_188 : f32 to vector<8x64xf32>
    %356 = arith.addf %355, %354 : vector<8x64xf32>
    %cst_189 = arith.constant 1.000000e+00 : f32
    %357 = vector.broadcast %cst_189 : f32 to vector<8x64xf32>
    %358 = arith.divf %357, %356 : vector<8x64xf32>
    %359 = arith.mulf %349, %358 : vector<8x64xf32>
    %360 = arith.mulf %359, %351 : vector<8x64xf32>
    %361 = arith.truncf %360 : vector<8x64xf32> to vector<8x64xbf16>
    %cst_190 = arith.constant dense<0.000000e+00> : vector<8x32xf32>
    %362 = tpu.matmul %361, %347, %cst_190 {dimension_numbers = #tpu.dot_dimension_numbers<[1], [0], [0], [1], [0, 0, 1, 1], [], []>} : vector<8x64xbf16>, vector<64x32xbf16>, vector<8x32xf32> -> vector<8x32xf32>
    %363 = vector.broadcast %341 : vector<8x1xf32> to vector<8x32xf32>
    %364 = arith.mulf %363, %362 : vector<8x32xf32>
    %365 = arith.addf %335, %364 : vector<8x32xf32>
    %366 = arith.addf %180, %365 : vector<8x32xf32>
    %c0_191 = arith.constant 0 : index
    %c0_192 = arith.constant 0 : index
    %367 = vector.load %arg16[%c0_191, %c0_192] : memref<1x32xf32, #tpu.memory_space<vmem>>, vector<1x32xf32>
    %c0_193 = arith.constant 0 : index
    %c0_194 = arith.constant 0 : index
    %368 = vector.load %arg17[%c0_193, %c0_194] : memref<1x32xf32, #tpu.memory_space<vmem>>, vector<1x32xf32>
    %cst_195 = arith.constant dense<0.000000e+00> : vector<8xf32>
    %369 = vector.multi_reduction <add>, %366, %cst_195 [1] : vector<8x32xf32> to vector<8xf32>
    %370 = vector.shape_cast %369 : vector<8xf32> to vector<8x1xf32>
    %cst_196 = arith.constant 3.200000e+01 : f32
    %371 = vector.broadcast %cst_196 : f32 to vector<8x1xf32>
    %372 = arith.divf %370, %371 : vector<8x1xf32>
    %373 = vector.broadcast %372 : vector<8x1xf32> to vector<8x32xf32>
    %374 = arith.subf %366, %373 : vector<8x32xf32>
    %375 = arith.mulf %374, %374 : vector<8x32xf32>
    %cst_197 = arith.constant dense<0.000000e+00> : vector<8xf32>
    %376 = vector.multi_reduction <add>, %375, %cst_197 [1] : vector<8x32xf32> to vector<8xf32>
    %377 = vector.shape_cast %376 : vector<8xf32> to vector<8x1xf32>
    %cst_198 = arith.constant 3.200000e+01 : f32
    %378 = vector.broadcast %cst_198 : f32 to vector<8x1xf32>
    %379 = arith.divf %377, %378 : vector<8x1xf32>
    %380 = vector.broadcast %372 : vector<8x1xf32> to vector<8x32xf32>
    %381 = arith.subf %366, %380 : vector<8x32xf32>
    %cst_199 = arith.constant 9.99999974E-6 : f32
    %382 = vector.broadcast %cst_199 : f32 to vector<8x1xf32>
    %383 = arith.addf %379, %382 : vector<8x1xf32>
    %384 = math.rsqrt %383 : vector<8x1xf32>
    %385 = vector.broadcast %384 : vector<8x1xf32> to vector<8x32xf32>
    %386 = arith.mulf %381, %385 : vector<8x32xf32>
    %387 = vector.broadcast %367 : vector<1x32xf32> to vector<8x32xf32>
    %388 = arith.mulf %386, %387 : vector<8x32xf32>
    %389 = vector.broadcast %368 : vector<1x32xf32> to vector<8x32xf32>
    %390 = arith.addf %388, %389 : vector<8x32xf32>
    %c0_200 = arith.constant 0 : index
    %c0_201 = arith.constant 0 : index
    %391 = vector.load %arg18[%c0_200, %c0_201] : memref<8x32xf32, #tpu.memory_space<vmem>>, vector<8x32xf32>
    tpu.vector_store %arg18[%c0_200, %c0_201], %390 {strides = array<i32>} : memref<8x32xf32, #tpu.memory_space<vmem>>, vector<8x32xf32>,
    return
  }
  func.func @transform_0(%arg0: i32) -> (i32, i32) {
    %c0_i32 = arith.constant 0 : i32
    %c0_i32_0 = arith.constant 0 : i32
    return %arg0, %c0_i32 : i32, i32
  }
  func.func @transform_1(%arg0: i32) -> (i32, i32, i32) {
    %c0_i32 = arith.constant 0 : i32
    %c0_i32_0 = arith.constant 0 : i32
    %c0_i32_1 = arith.constant 0 : i32
    %c0_i32_2 = arith.constant 0 : i32
    return %c0_i32, %c0_i32_0, %c0_i32_1 : i32, i32, i32
  }
  func.func @transform_2(%arg0: i32) -> (i32, i32) {
    %c0_i32 = arith.constant 0 : i32
    %c0_i32_0 = arith.constant 0 : i32
    %c0_i32_1 = arith.constant 0 : i32
    return %c0_i32, %c0_i32_0 : i32, i32
  }
  func.func @transform_3(%arg0: i32) -> (i32, i32, i32) {
    %c0_i32 = arith.constant 0 : i32
    %c0_i32_0 = arith.constant 0 : i32
    %c0_i32_1 = arith.constant 0 : i32
    %c0_i32_2 = arith.constant 0 : i32
    return %c0_i32, %c0_i32_0, %c0_i32_1 : i32, i32, i32
  }
  func.func @transform_4(%arg0: i32) -> (i32, i32, i32) {
    %c0_i32 = arith.constant 0 : i32
    %c0_i32_0 = arith.constant 0 : i32
    %c0_i32_1 = arith.constant 0 : i32
    %c0_i32_2 = arith.constant 0 : i32
    return %c0_i32, %c0_i32_0, %c0_i32_1 : i32, i32, i32
  }
  func.func @transform_5(%arg0: i32) -> (i32, i32, i32) {
    %c0_i32 = arith.constant 0 : i32
    %c0_i32_0 = arith.constant 0 : i32
    %c0_i32_1 = arith.constant 0 : i32
    %c0_i32_2 = arith.constant 0 : i32
    return %c0_i32, %c0_i32_0, %c0_i32_1 : i32, i32, i32
  }
  func.func @transform_6(%arg0: i32) -> (i32, i32) {
    %c0_i32 = arith.constant 0 : i32
    %c0_i32_0 = arith.constant 0 : i32
    %c0_i32_1 = arith.constant 0 : i32
    return %c0_i32, %c0_i32_0 : i32, i32
  }
  func.func @transform_7(%arg0: i32) -> (i32, i32) {
    %c0_i32 = arith.constant 0 : i32
    %c0_i32_0 = arith.constant 0 : i32
    %c0_i32_1 = arith.constant 0 : i32
    return %c0_i32, %c0_i32_0 : i32, i32
  }
  func.func @transform_8(%arg0: i32) -> (i32, i32) {
    %c0_i32 = arith.constant 0 : i32
    %c0_i32_0 = arith.constant 0 : i32
    %c0_i32_1 = arith.constant 0 : i32
    return %c0_i32, %c0_i32_0 : i32, i32
  }
  func.func @transform_9(%arg0: i32) -> (i32, i32) {
    %c0_i32 = arith.constant 0 : i32
    %c0_i32_0 = arith.constant 0 : i32
    %c0_i32_1 = arith.constant 0 : i32
    return %c0_i32, %c0_i32_0 : i32, i32
  }
  func.func @transform_10(%arg0: i32) -> (i32, i32) {
    %c0_i32 = arith.constant 0 : i32
    %c0_i32_0 = arith.constant 0 : i32
    %c0_i32_1 = arith.constant 0 : i32
    return %c0_i32, %c0_i32_0 : i32, i32
  }
  func.func @transform_11(%arg0: i32) -> (i32, i32) {
    %c0_i32 = arith.constant 0 : i32
    %c0_i32_0 = arith.constant 0 : i32
    %c0_i32_1 = arith.constant 0 : i32
    return %c0_i32, %c0_i32_0 : i32, i32
  }
  func.func @transform_12(%arg0: i32) -> (i32, i32, i32) {
    %c0_i32 = arith.constant 0 : i32
    %c0_i32_0 = arith.constant 0 : i32
    %c0_i32_1 = arith.constant 0 : i32
    %c0_i32_2 = arith.constant 0 : i32
    return %c0_i32, %c0_i32_0, %c0_i32_1 : i32, i32, i32
  }
  func.func @transform_13(%arg0: i32) -> (i32, i32, i32) {
    %c0_i32 = arith.constant 0 : i32
    %c0_i32_0 = arith.constant 0 : i32
    %c0_i32_1 = arith.constant 0 : i32
    %c0_i32_2 = arith.constant 0 : i32
    return %c0_i32, %c0_i32_0, %c0_i32_1 : i32, i32, i32
  }
  func.func @transform_14(%arg0: i32) -> (i32, i32, i32) {
    %c0_i32 = arith.constant 0 : i32
    %c0_i32_0 = arith.constant 0 : i32
    %c0_i32_1 = arith.constant 0 : i32
    %c0_i32_2 = arith.constant 0 : i32
    return %c0_i32, %c0_i32_0, %c0_i32_1 : i32, i32, i32
  }
  func.func @transform_15(%arg0: i32) -> (i32, i32) {
    %c0_i32 = arith.constant 0 : i32
    %c0_i32_0 = arith.constant 0 : i32
    %c0_i32_1 = arith.constant 0 : i32
    return %c0_i32, %c0_i32_0 : i32, i32
  }
  func.func @transform_16(%arg0: i32) -> (i32, i32) {
    %c0_i32 = arith.constant 0 : i32
    %c0_i32_0 = arith.constant 0 : i32
    %c0_i32_1 = arith.constant 0 : i32
    return %c0_i32, %c0_i32_0 : i32, i32
  }
  func.func @transform_17(%arg0: i32) -> (i32, i32) {
    %c0_i32 = arith.constant 0 : i32
    %c0_i32_0 = arith.constant 0 : i32
    return %arg0, %c0_i32 : i32, i32
  }
}

</mosaic_0001>

<bundles_post_ra>
// kernel: forward.5
= control target key start
LH: loop header
LB: loop body
LE: loop exit
PB: predicated region body
PF: predicated region fallthrough
CT: control target
= control target key end

     0   :  { %s767_s24 = smov 0   ;;  %s769_s25 = smov 0   ;;  %s884_s0 = inlined_call_operand.vmem [shape: f32[16,32], index: 0, kind: input, shape index: {}]   ;;  %s885_s1 = inlined_call_operand.vmem [shape: f32[1,32], index: 1, kind: input, shape index: {}]   ;;  %s886_s2 = inlined_call_operand.vmem [shape: f32[1,32], index: 2, kind: input, shape index: {}]   ;;  %s887_s3 = inlined_call_operand.vmem [shape: bf16[32,64], index: 3, kind: input, shape index: {}]   ;;  %s888_s4 = inlined_call_operand.vmem [shape: bf16[2,32,32], index: 4, kind: input, shape index: {}]   ;;  %s889_s5 = inlined_call_operand.vmem [shape: f32[2,1,32], index: 5, kind: input, shape index: {}]   ;;  %s890_s6 = inlined_call_operand.vmem [shape: f32[2,1,32], index: 6, kind: input, shape index: {}]   ;;  %s891_s7 = inlined_call_operand.vmem [shape: f32[3,16,64], index: 7, kind: output, shape index: {}]  }
   0x1   :  { %s771_s26 = smov 0  }
   0x2 LB: > { %s780_s27 = sadd.s32 4294967295, %s724_s26   ;;  %s782_s28 = sadd.s32 1, %s724_s26   ;;  %s724_s26 = sphi %s771_s26, %s895_s26   ;;  %s720_s25 = sphi %s769_s25, %s894_s25   ;;  %s716_s24 = sphi %s767_s24, %s893_s24  }
   0x3   : > { %s173_s29 = ssub.s32 %s724_s26, %s782_s28  ;;  %s176_s30 = sadd.s32 1, %s720_s25 }
   0x4   : > { %p174_p0 = scmp.eq.s32.totalorder %s173_s29, 0  ;;  %p186_p1 = scmp.ne.s32.totalorder %s720_s25, %s716_s24 }
   0x5   : > { %p187_p2 = scmp.eq.s32.totalorder %s780_s27, 1  ;;  %p614_p3 = scmp.ge.s32.totalorder %s724_s26, 1 }
   0x6   : > { %s790_s8 = scalar_select %p174_p0, %s720_s25, %s176_s30  }
   0x7   : > { %p792_p4 = por %p187_p2, %p186_p1  ;;  %p236_p5 = scmp.lt.s32.totalorder %s724_s26, 3 }
   0x9   : > { %p237_p6 = pnand %p614_p3, %p236_p5 }
   0xa   : > { %p266_p7 = scmp.lt.s32.totalorder (!%p237_p6), %s780_s27, 1 }
   0xb   : > { %240 = sbr.rel (%p237_p6) target bundleno = 830 (0x33e), region = 48 }
  0x10   : > { %s267_s10 = scalar_select %p266_p7, %s780_s27, 1  ;;  %vm278_vm0 = vcmask 261120   ;;  %v726_v2 = vmov 32.0   ;;  %v657_v14 = vld [vmem:[%s887_s3 + $0x8] sm:$0xff]  ;;  %v661_v16 = vld [vmem:[%s888_s4 + $0x18] sm:$0xff]  ;;  %v656_v17 = vld [vmem:[%s887_s3] sm:$0xff] }
  0x11   : > { %694 = vrcp.f32 %v726_v2  ;;  %v659_v15 = vld [vmem:[%s888_s4 + $0x8] sm:$0xff]  ;;  %338 = vmatpush.bf16.msra.mxu0 %v657_v14  ;;  %v658_v18 = vld [vmem:[%s888_s4] sm:$0xff]  ;;  %450 = vmatpush.bf16.msra.mxu3 %v661_v16  ;;  %v660_v19 = vld [vmem:[%s888_s4 + $0x10] sm:$0xff]  ;;  %vm345_vm5 = vcmask 523264   ;;  %s653_s26 = sshll.u32 (%p792_p4), %s780_s27, 3 }
  0x12   : > { %s615_s11 = sshll.u32 %s267_s10, 3  ;;  %369 = vmatpush.bf16.msra.mxu1 %v659_v15  ;;  %418 = vmatpush.bf16.msra.mxu2 %v657_v14  ;;  %v688_v29 = vld [vmem:[%s885_s1] ss:$0 sm:$0xff]  ;;  %v692_v15 = vld [vmem:[%s889_s5 + $0x1] ss:$0 sm:$0xff]  ;;  %s518_s10 = scalar_lea.vmem (%p792_p4), %s891_s7, %s653_s26 }
  0x13   : > { %s269_s14 = scalar_lea.vmem %s884_s0, %s615_s11  ;;  %v689_v32 = vld [vmem:[%s886_s2] ss:$0 sm:$0xff] }
  0x14   : > { %v271_v0 = vld [vmem:[%s269_s14] sm:$0xff]  ;;  %s263_s14 = sand.u32 1, %s716_s24  }
  0x15   : > { %v279_v1 = vsel %vm278_vm0, %v271_v0, 0.0  ;;  %339 = vmatpush.bf16.msra.mxu0 %v656_v17  ;;  %451 = vmatpush.bf16.msra.mxu3 %v660_v19  ;;  %s662_s15 = smul.u32 24, %s263_s14 }
  0x16   : > { %280 = vadd.xlane.f32.xlu0 %v279_v1  ;;  %370 = vmatpush.bf16.msra.mxu1 %v658_v18  ;;  %v693_v18 = vld [vmem:[%s890_s6 + $0x1] ss:$0 sm:$0xff] }
  0x17   : > { %v695_v3 = vpop.eup %694  ;;  %419 = vmatpush.bf16.msra.mxu2 %v656_v17  ;;  %s835_s16 = scalar_lea.vmem [#allocation2], %s662_s15 }
  0x18   : > { %v283_v4 = vmul.f32 32.0, %v695_v3  ;;  %vm287_vm1 = vweird.f32 %v695_v3 }
  0x19   : > { %501 = vmatpush.bf16.msrb.mxu0 %v657_v14 }
  0x1a   : > { %v284_v5 = vsub.f32 1.0, %v283_v4  ;;  %v690_v4 = vld [vmem:[%s889_s5] ss:$0 sm:$0xff] }
  0x1c   : > { %v285_v6 = vmul.f32 %v695_v3, %v284_v5 }
  0x1d   : > { %502 = vmatpush.bf16.msrb.mxu0 %v656_v17 }
  0x1e   : > { %v286_v7 = vadd.f32 %v695_v3, %v285_v6 }
  0x20   : > { %v802_v8 = vsel %vm287_vm1, %v695_v3, %v286_v7 }
  0x89   : > { %v281_v9 = vpop.xlane.xlu0 %280 }
  0x8a   : > { %v289_v10 = vmul.f32 %v802_v8, %v281_v9 }
  0x8c   : > { %v290_v11 = vsub.f32 %v271_v0, %v289_v10 }
  0x8e   : > { %v291_v12 = vmul.f32 %v290_v11, %v290_v11 }
  0x90   : > { %v292_v13 = vsel %vm278_vm0, %v291_v12, 0.0 }
  0x91   : > { %293 = vadd.xlane.f32.xlu0 %v292_v13 }
 0x104   : > { %v294_v20 = vpop.xlane.xlu0 %293 }
 0x105   : > { %v295_v21 = vmul.f32 %v294_v20, %v802_v8 }
 0x107   : > { %v296_v22 = vadd.f32 1e-05, %v295_v21 }
 0x109   : > { %696 = vrsqrt.f32 %v296_v22  ;;  %vm303_vm3 = vweird.f32 %v296_v22 }
 0x10f   : > { %v697_v23 = vpop.eup %696 }
 0x110   : > { %v298_v24 = vmul.f32 %v697_v23, %v296_v22  ;;  %vm304_vm2 = vweird.f32 %v697_v23 }
 0x111   : > { %vm305_vm4 = vmor %vm303_vm3, %vm304_vm2 }
 0x112   : > { %v299_v25 = vmul.f32 %v697_v23, %v298_v24 }
 0x114   : > { %v300_v26 = vmul.f32 0.5, %v299_v25 }
 0x116   : > { %v301_v27 = vsub.f32 1.5, %v300_v26 }
 0x118   : > { %v302_v28 = vmul.f32 %v697_v23, %v301_v27 }
 0x11a   : > { %v306_v30 = vsel %vm305_vm4, %v697_v23, %v302_v28 }
 0x11b   : > { %v307_v31 = vmul.f32 %v306_v30, %v290_v11 }
 0x11d   : > { %v311_v33 = vmul.f32 %v688_v29, %v307_v31 }
 0x11f   : > { %v315_v34 = vadd.f32 %v689_v32, %v311_v33 }
 0x121   : > { %v316_v35 = vpack.c.bf16 %v315_v34, %v315_v34 }
 0x123   : > { %624 = vmatmul.msk.bf16.vlgmr.msra.gmra.mxu0 %vm278_vm0, %v316_v35  ;;  %633 = vmatmul.msk.bf16.vlgmr.msra.gmra.mxu1 %vm278_vm0, %v316_v35 }
 0x124   : > { %648 = vmatmul.msk.bf16.vlgmr.msra.gmra.mxu3 %vm278_vm0, %v316_v35 }
 0x1a0   : > { %v341_v36 = vpop.f32.mrf.mxu0  ;;  %v372_v37 = vpop.f32.mrf.mxu1 }
 0x1a1   : > { %346 = vst.msk [vmem:[%s835_s16] sm:$0xff] %vm345_vm5, %v341_v36  ;;  %v378_v38 = vsel %vm278_vm0, %v372_v37, 0.0 }
 0x1a2   : > { %379 = vadd.xlane.f32.xlu1 %v378_v38 }
 0x1a7   : > { %v453_v39 = vpop.f32.mrf.mxu3 }
 0x1a8   : > { %v343_v40 = vpop.f32.mrf.mxu0  ;;  %v374_v41 = vpop.f32.mrf.mxu1  ;;  %v461_v42 = vsel %vm278_vm0, %v453_v39, 0.0  ;;  %v551_v26 = vld [vmem:[%s835_s16] sm:$0xff] (%p792_p4) }
 0x1a9   : > { %552 = vst [vmem:[%s518_s10] sm:$0xff] (%p792_p4), %v551_v26 }
 0x1aa   : > { %462 = vadd.xlane.f32.xlu1 %v461_v42 }
 0x1af   : > { %v455_v43 = vpop.f32.mrf.mxu3 }
 0x215   : > { %v380_v44 = vpop.xlane.xlu1 %379 }
 0x216   : > { %v381_v45 = vmul.f32 %v380_v44, %v802_v8 }
 0x218   : > { %v382_v46 = vsub.f32 %v372_v37, %v381_v45 }
 0x21a   : > { %v383_v47 = vmul.f32 %v382_v46, %v382_v46 }
 0x21c   : > { %v384_v48 = vsel %vm278_vm0, %v383_v47, 0.0 }
 0x21d   : > { %385 = vadd.xlane.f32.xlu2 %v384_v48  ;;  %v463_v49 = vpop.xlane.xlu1 %462 }
 0x21e   : > { %v464_v50 = vmul.f32 %v463_v49, %v802_v8 }
 0x220   : > { %v465_v51 = vsub.f32 %v453_v39, %v464_v50 }
 0x222   : > { %v466_v52 = vmul.f32 %v465_v51, %v465_v51 }
 0x224   : > { %v467_v53 = vsel %vm278_vm0, %v466_v52, 0.0 }
 0x225   : > { %468 = vadd.xlane.f32.xlu2 %v467_v53 }
 0x290   : > { %v386_v54 = vpop.xlane.xlu2 %385 }
 0x291   : > { %v387_v55 = vmul.f32 %v386_v54, %v802_v8 }
 0x293   : > { %v388_v56 = vadd.f32 1e-05, %v387_v55 }
 0x295   : > { %698 = vrsqrt.f32 %v388_v56  ;;  %vm395_vm7 = vweird.f32 %v388_v56 }
 0x298   : > { %v469_v57 = vpop.xlane.xlu2 %468 }
 0x299   : > { %v470_v58 = vmul.f32 %v469_v57, %v802_v8  ;;  %v691_v8 = vld [vmem:[%s890_s6] ss:$0 sm:$0xff] }
 0x29b   : > { %v699_v59 = vpop.eup %698  ;;  %v471_v60 = vadd.f32 1e-05, %v470_v58 }
 0x29c   : > { %v390_v61 = vmul.f32 %v699_v59, %v388_v56  ;;  %vm396_vm6 = vweird.f32 %v699_v59 }
 0x29d   : > { %700 = vrsqrt.f32 %v471_v60  ;;  %vm397_vm8 = vmor %vm395_vm7, %vm396_vm6  ;;  %vm478_vm10 = vweird.f32 %v471_v60 }
 0x29e   : > { %v391_v62 = vmul.f32 %v699_v59, %v390_v61 }
 0x2a0   : > { %v392_v63 = vmul.f32 0.5, %v391_v62 }
 0x2a2   : > { %v393_v0 = vsub.f32 1.5, %v392_v63 }
 0x2a3   : > { %v701_v1 = vpop.eup %700 }
 0x2a4   : > { %v394_v2 = vmul.f32 %v699_v59, %v393_v0  ;;  %v473_v3 = vmul.f32 %v701_v1, %v471_v60  ;;  %vm479_vm9 = vweird.f32 %v701_v1 }
 0x2a5   : > { %vm480_vm11 = vmor %vm478_vm10, %vm479_vm9 }
 0x2a6   : > { %v398_v5 = vsel %vm397_vm8, %v699_v59, %v394_v2  ;;  %v474_v6 = vmul.f32 %v701_v1, %v473_v3 }
 0x2a7   : > { %v399_v7 = vmul.f32 %v398_v5, %v382_v46 }
 0x2a8   : > { %v475_v9 = vmul.f32 0.5, %v474_v6 }
 0x2a9   : > { %v403_v10 = vmul.f32 %v690_v4, %v399_v7 }
 0x2aa   : > { %v476_v11 = vsub.f32 1.5, %v475_v9 }
 0x2ab   : > { %v407_v12 = vadd.f32 %v691_v8, %v403_v10 }
 0x2ac   : > { %v477_v13 = vmul.f32 %v701_v1, %v476_v11 }
 0x2ad   : > { %v408_v14 = vpack.c.bf16 %v407_v12, %v407_v12 }
 0x2ae   : > { %v481_v16 = vsel %vm480_vm11, %v701_v1, %v477_v13 }
 0x2af   : > { %v482_v17 = vmul.f32 %v481_v16, %v465_v51  ;;  %634 = vmatmul.msk.bf16.vlgmr.msra.gmra.mxu2 %vm278_vm0, %v408_v14 }
 0x2b1   : > { %v486_v19 = vmul.f32 %v692_v15, %v482_v17 }
 0x2b3   : > { %v490_v20 = vadd.f32 %v693_v18, %v486_v19 }
 0x2b5   : > { %v491_v21 = vpack.c.bf16 %v490_v20, %v490_v20 }
 0x2b7   : > { %651 = vmatmul.msk.bf16.vlgmr.msrb.gmra.mxu0 %vm278_vm0, %v491_v21 }
 0x332   : > { %v421_v22 = vpop.f32.mrf.mxu2 }
 0x333   : > { %635 = vst.msk [vmem:[%s835_s16 + $0x8] sm:$0xff] %vm345_vm5, %v421_v22 }
 0x334   : > { %v504_v23 = vpop.f32.mrf.mxu0 }
 0x335   : > { %652 = vst.msk [vmem:[%s835_s16 + $0x10] sm:$0xff] %vm345_vm5, %v504_v23 }
 0x338   : > { %516 = sbr.rel (!%p792_p4) target bundleno = 830 (0x33e), region = 52 }
 0x33a   : > { %v423_v24 = vpop.f32.mrf.mxu2  ;;  %v553_v27 = vld [vmem:[%s835_s16 + $0x8] sm:$0xff] (%p792_p4) }
 0x33b   : > { %554 = vst [vmem:[%s518_s10 + $0x10] sm:$0xff] (%p792_p4), %v553_v27 }
 0x33c   : > { %v506_v25 = vpop.f32.mrf.mxu0  ;;  %v555_v28 = vld [vmem:[%s835_s16 + $0x10] sm:$0xff] (%p792_p4) }
 0x33d   : > { %556 = vst [vmem:[%s518_s10 + $0x20] sm:$0xff] %v555_v28 }
 0x33e PF: > { %p14_p8 = scmp.ge.s32.totalorder %s782_s28, 4   ;;  %s893_s24 = smov %s720_s25 }
 0x33f   : > { %s894_s25 = smov %s790_s8  ;;  %s895_s26 = smov %s782_s28 }
 0x340   :  { %16 = sbr.rel (!%p14_p8) target bundleno = 2 (0x2), region = 121 }

// kernel: forward.3
= control target key start
LH: loop header
LB: loop body
LE: loop exit
PB: predicated region body
PF: predicated region fallthrough
CT: control target
= control target key end

     0   :  { %s2678_s24 = smov 0   ;;  %s3103_s0 = inlined_call_operand.vmem [shape: f32[16,32], index: 0, kind: input, shape index: {}]   ;;  %s3104_s1 = inlined_call_operand.vmem [shape: bf16[4,32,8], index: 1, kind: input, shape index: {}]   ;;  %s3105_s2 = inlined_call_operand.vmem [shape: bf16[32,16], index: 2, kind: input, shape index: {}]   ;;  %s3106_s3 = inlined_call_operand.vmem [shape: bf16[4,16,8], index: 3, kind: input, shape index: {}]   ;;  %s3107_s4 = inlined_call_operand.vmem [shape: bf16[4,16,8], index: 4, kind: input, shape index: {}]   ;;  %s3108_s5 = inlined_call_operand.vmem [shape: bf16[4,8,32], index: 5, kind: input, shape index: {}]   ;;  %s3109_s6 = inlined_call_operand.vmem [shape: f32[1,32], index: 6, kind: input, shape index: {}]   ;;  %s3110_s7 = inlined_call_operand.vmem [shape: f32[1,32], index: 7, kind: input, shape index: {}]   ;;  %s3111_s8 = inlined_call_operand.vmem [shape: bf16[32,4], index: 8, kind: input, shape index: {}]   ;;  %s3112_s9 = inlined_call_operand.vmem [shape: bf16[32,64], index: 9, kind: input, shape index: {}]   ;;  %s3113_s10 = inlined_call_operand.vmem [shape: bf16[32,64], index: 10, kind: input, shape index: {}]   ;;  %s3114_s11 = inlined_call_operand.vmem [shape: bf16[64,32], index: 11, kind: input, shape index: {}]   ;;  %s3115_s12 = inlined_call_operand.vmem [shape: bf16[4,32,64], index: 12, kind: input, shape index: {}]   ;;  %s3116_s13 = inlined_call_operand.vmem [shape: bf16[4,32,64], index: 13, kind: input, shape index: {}]   ;;  %s3117_s14 = inlined_call_operand.vmem [shape: bf16[4,64,32], index: 14, kind: input, shape index: {}]   ;;  %s3118_s15 = inlined_call_operand.vmem [shape: f32[1,32], index: 15, kind: input, shape index: {}]   ;;  %s3119_s16 = inlined_call_operand.vmem [shape: f32[1,32], index: 16, kind: input, shape index: {}]   ;;  %s3120_s17 = inlined_call_operand.vmem [shape: f32[16,32], index: 17, kind: output, shape index: {}]  }
   0x1   :  { %3122 = sst [smem:[#allocation2_spill]] %s3103_s0 }
   0x2   :  { %3123 = sst [smem:[#allocation3_spill]] %s3104_s1 }
   0x3 LB: > { %s2093_s25 = sadd.s32 4294967295, %s2585_s24   ;;  %p2097_p0 = scmp.ge.s32.totalorder %s2585_s24, 1  ;;  %s2585_s24 = sphi %s2678_s24, %s27_s24  }
   0x4   : > { %p486_p1 = scmp.lt.s32.totalorder %s2585_s24, 3 }
   0x6   : > { %p487_p2 = pnand %p2097_p0, %p486_p1 }
   0x7   : > { %p536_p3 = scmp.lt.s32.totalorder (!%p487_p2), %s2093_s25, 1  ;;  %s3124_s0 = sld [smem:[#allocation3_spill]] (!%p487_p2) }
   0x8   : > { %490 = sbr.rel (%p487_p2) target bundleno = 4344 (0x10f8), region = 88  ;;  %s3125_s23 = sld [smem:[#allocation2_spill]] (!%p487_p2) }
   0xd   : > { %v2459_v0 = vld [vmem:[%s3105_s2 + $0x8] sm:$0xff]  ;;  %v2458_v2 = vld [vmem:[%s3105_s2] sm:$0xff]  ;;  %s3127_s25 = smov (!%p536_p3, %s2093_s25), 1  ;;  %vm563_vm0 = vcmask 261120   ;;  %vm623_vm1 = vcmask 130048   ;;  %vm701_vm2 = vcmask 1043456   ;;  %v580_v30 = vlaneseq }
   0xe   : > { %v2461_v1 = vld [vmem:[%s3124_s0 + $0x8] sm:$0xff]  ;;  %573 = vmatpush.bf16.msra.mxu0 %v2459_v0  ;;  %v2460_v3 = vld [vmem:[%s3124_s0] sm:$0xff]  ;;  %s2098_s20 = sshll.u32 %s3127_s25, 3  ;;  %vm663_vm3 = vcmask 64512   ;;  %v2465_v28 = vld [vmem:[%s3124_s0 + $0x18] sm:$0xff]  ;;  %vm1267_vm9 = vcmask 31744  }
   0xf   : > { %607 = vmatpush.bf16.msra.mxu1 %v2461_v1  ;;  %s539_s26 = scalar_lea.vmem %s3125_s23, %s2098_s20  ;;  %v2462_v6 = vld [vmem:[%s3106_s3] sm:$0xff]  ;;  %v2466_v8 = vld [vmem:[%s3106_s3 + $0x8] sm:$0xff]  ;;  %v2464_v29 = vld [vmem:[%s3124_s0 + $0x10] sm:$0xff]  ;;  %v2750_v31 = vshrl.u32 %v580_v30, 7  ;;  %v2752_v32 = vand.u32 127, %v580_v30  ;;  %s543_s23 = scalar_lea.vmem %s3120_s17, %s2098_s20 }
  0x10   : > { %v2706_v4 = vld [vmem:[%s539_s26] sm:$0xff]  ;;  %634 = vmatpush.bf16.msra.mxu2 %v2462_v6  ;;  %v2467_v20 = vld [vmem:[%s3107_s4 + $0x8] sm:$0xff] }
  0x11   : > { %v2710_v5 = vpack.c.bf16 %v2706_v4, %v2706_v4  ;;  %v2463_v7 = vld [vmem:[%s3107_s4] sm:$0xff]  ;;  %vm584_vm4 = vcmp.le.s32.totalorder %v2752_v32, %v2750_v31 }
  0x12   : > { %574 = vmatpush.bf16.msra.mxu0 %v2458_v2  ;;  %655 = vmatpush.bf16.msra.mxu3 %v2463_v7  ;;  %v718_v54 = vld [vmem:[%s3108_s5] sm:$0xf] }
  0x13   : > { %608 = vmatpush.bf16.msra.mxu1 %v2460_v3  ;;  %v875_v55 = vsel %vm701_vm2, %v718_v54, 0 }
  0x15   : > { %2108 = vmatmul.msk.bf16.vlgmr.msra.gmra.mxu0 %vm563_vm0, %v2710_v5 }
  0x16   : > { %2117 = vmatmul.msk.bf16.vlgmr.msra.gmra.mxu1 %vm563_vm0, %v2710_v5  ;;  %743 = vmatpush.bf16.msrb.mxu0 %v2465_v28 }
  0x17   : > { %766 = vmatpush.bf16.msrb.mxu1 %v2466_v8 }
  0x1a   : > { %744 = vmatpush.bf16.msrb.mxu0 %v2464_v29 }
  0x25   : > { %2142 = vmatmul.msk.bf16.vlgmr.msrb.gmra.mxu0 %vm563_vm0, %v2710_v5 }
  0x92   : > { %v576_v9 = vpop.f32.mrf.mxu0 }
  0x93   : > { %v610_v10 = vpop.f32.mrf.mxu1  ;;  %v2725_v11 = vpack.c.bf16 %v576_v9, %v576_v9  ;;  %v2470_v9 = vld [vmem:[%s3106_s3 + $0x10] sm:$0xff] }
  0x94   : > { %v661_v25 = vpack.c.bf16 %v610_v10, %v610_v10  ;;  %v2469_v10 = vld [vmem:[%s3124_s0 + $0x28] sm:$0xff] }
  0x95   : > { %2122 = vmatmul.msk.bf16.vlgmr.msra.gmra.mxu2 %vm623_vm1, %v2725_v11  ;;  %2127 = vmatmul.msk.bf16.vlgmr.msra.gmra.mxu3 %vm623_vm1, %v2725_v11 }
  0x96   : > { %2149 = vmatmul.msk.bf16.vlgmr.msrb.gmra.mxu1 %vm623_vm1, %v2725_v11 }
  0x9a   : > { %v578_v12 = vpop.f32.mrf.mxu0 }
  0x9b   : > { %v612_v13 = vpop.f32.mrf.mxu1  ;;  %v2468_v12 = vld [vmem:[%s3124_s0 + $0x20] sm:$0xff] }
  0xa2   : > { %v746_v47 = vpop.f32.mrf.mxu0 }
  0xa3   : > { %v794_v53 = vpack.c.bf16 %v746_v47, %v746_v47 }
  0xaa   : > { %v748_v48 = vpop.f32.mrf.mxu0 }
 0x113   : > { %v768_v14 = vpop.f32.mrf.mxu1 }
 0x114   : > { %v795_v15 = vpack.c.bf16 %v768_v14, %v768_v14 }
 0x116   : > { %v800_v24 = vsel %vm663_vm3, %v795_v15, 0 }
 0x118   : > { %v636_v16 = vpop.f32.mrf.mxu2  ;;  %v657_v17 = vpop.f32.mrf.mxu3 }
 0x119   : > { %v662_v18 = vpack.c.bf16 %v636_v16, %v636_v16  ;;  %v697_v19 = vpack.c.bf16 %v657_v17, %v657_v17  ;;  %v2159_v17 = vld [vmem:[%s3108_s5 + $0x4] sm:$0xf] }
 0x11b   : > { %v770_v21 = vpop.f32.mrf.mxu1  ;;  %v668_v22 = vsel %vm663_vm3, %v662_v18, 0  ;;  %v703_v23 = vsel %vm701_vm2, %v697_v19, 0  ;;  %v856_v18 = vsel %vm701_vm2, %v2159_v17, 0  ;;  %v2471_v19 = vld [vmem:[%s3107_s4 + $0x10] sm:$0xff] }
 0x11c   : > { %677 = vmatpush.bf16.xpose.msrb.mxu2 %v668_v22  ;;  %712 = vmatpush.bf16.msrb.mxu3 %v703_v23 }
 0x11d   : > { %865 = vmatpush.bf16.msra.mxu1 %v856_v18 }
 0x120   : > { %809 = vmatpush.bf16.xpose.msra.mxu3 %v800_v24  ;;  %v638_v26 = vpop.f32.mrf.mxu2  ;;  %v659_v27 = vpop.f32.mrf.mxu3 }
 0x121   : > { %958 = vmatpush.bf16.msrb.mxu1 %v2471_v19  ;;  %v2474_v27 = vld [vmem:[%s3106_s3 + $0x18] sm:$0xff] }
 0x123   : > { %2128 = vmatmul.msk.bf16.vlgmr.msrb.gmra.mxu2 %vm663_vm3, %v661_v25 }
 0x124   : > { %788 = vmatpush.bf16.msra.mxu2 %v2467_v20 }
 0x128   : > { %884 = vmatpush.bf16.msrb.mxu2 %v875_v55  ;;  %v2475_v55 = vld [vmem:[%s3107_s4 + $0x18] sm:$0xff] }
 0x133   : > { %2156 = vmatmul.msk.bf16.vlgmr.msra.gmra.mxu2 %vm623_vm1, %v2725_v11 }
 0x1a6   : > { %v679_v33 = vpop.f32.mrf.mxu2 }
 0x1a7   : > { %v683_v34 = vmul.f32 0.35355338, %v679_v33 }
 0x1a9   : > { %v684_v35 = vsel %vm584_vm4, %v683_v34, -1e+30 }
 0x1aa   : > { %v685_v36 = vsel %vm663_vm3, %v684_v35, -inf }
 0x1ab   : > { %686 = vmax.xlane.f32.xlu0 %v685_v36  ;;  %v2191_v36 = vld [vmem:[%s3108_s5 + $0x8] sm:$0xf] }
 0x1ae   : > { %v681_v37 = vpop.f32.mrf.mxu2 }
 0x1b6   : > { %v790_v38 = vpop.f32.mrf.mxu2 }
 0x1b7   : > { %v829_v39 = vpack.c.bf16 %v790_v38, %v790_v38  ;;  %v1026_v38 = vsel %vm701_vm2, %v2191_v36, 0 }
 0x1b9   : > { %v834_v40 = vsel %vm701_vm2, %v829_v39, 0 }
 0x1ba   : > { %843 = vmatpush.bf16.msra.mxu0 %v834_v40 }
 0x1be   : > { %v792_v41 = vpop.f32.mrf.mxu2  ;;  %936 = vmatpush.bf16.msrb.mxu0 %v2470_v9 }
 0x21e   : > { %v687_v42 = vpop.xlane.xlu0 %686 }
 0x21f   : > { %v688_v43 = vsub.f32 %v684_v35, %v687_v42 }
 0x221   : > { %v689_v44 = vmul.f32 1.442695, %v688_v43 }
 0x223   : > { %2531 = vpow2.f32 %v689_v44 }
 0x229   : > { %v2532_v45 = vpop.eup %2531 }
 0x22a   : > { %v691_v46 = vsel %vm663_vm3, %v2532_v45, 0.0 }
 0x22b   : > { %692 = vadd.xlane.f32.xlu0 %v691_v46 }
 0x29e   : > { %v693_v49 = vpop.xlane.xlu0 %692 }
 0x29f   : > { %2533 = vrcp.f32 %v693_v49 }
 0x2a5   : > { %v2534_v50 = vpop.eup %2533 }
 0x2a6   : > { %v695_v51 = vmul.f32 %v2534_v50, %v2532_v45 }
 0x2a8   : > { %v696_v52 = vpack.c.bf16 %v695_v51, %v695_v51 }
 0x2aa   : > { %2129 = vmatmul.msk.bf16.vlgmr.msrb.gmra.mxu3 %vm663_vm3, %v696_v52 }
 0x2ab   : > { %913 = vmatpush.bf16.msrb.mxu3 %v2469_v10 }
 0x2af   : > { %914 = vmatpush.bf16.msrb.mxu3 %v2468_v12 }
 0x2ba   : > { %2157 = vmatmul.msk.bf16.vlgmr.msra.gmra.mxu3 %vm663_vm3, %v794_v53 }
 0x2ca   : > { %2174 = vmatmul.msk.bf16.vlgmr.msrb.gmra.mxu3 %vm563_vm0, %v2710_v5 }
 0x32d   : > { %v714_v56 = vpop.f32.mrf.mxu3 }
 0x32e   : > { %v719_v57 = vpack.c.bf16 %v714_v56, %v714_v56  ;;  %v2473_v56 = vld [vmem:[%s3124_s0 + $0x38] sm:$0xff] }
 0x330   : > { %2161 = vmatmul.msk.bf16.vlgmr.msrb.gmra.mxu2 %vm663_vm3, %v719_v57  ;;  %v2472_v57 = vld [vmem:[%s3124_s0 + $0x30] sm:$0xff] }
 0x335   : > { %v716_v58 = vpop.f32.mrf.mxu3 }
 0x33d   : > { %v811_v59 = vpop.f32.mrf.mxu3 }
 0x33e   : > { %v815_v60 = vmul.f32 0.35355338, %v811_v59 }
 0x340   : > { %v816_v61 = vsel %vm584_vm4, %v815_v60, -1e+30 }
 0x341   : > { %v817_v62 = vsel %vm663_vm3, %v816_v61, -inf }
 0x342   : > { %818 = vmax.xlane.f32.xlu1 %v817_v62 }
 0x345   : > { %v813_v63 = vpop.f32.mrf.mxu3 }
 0x34d   : > { %v916_v20 = vpop.f32.mrf.mxu3 }
 0x34e   : > { %v964_v29 = vpack.c.bf16 %v916_v20, %v916_v20 }
 0x355   : > { %v918_v21 = vpop.f32.mrf.mxu3 }
 0x3b3   : > { %v2773_v0 = vpop.f32.mrf.mxu2 }
 0x3b5   : > { %v819_v1 = vpop.xlane.xlu1 %818 }
 0x3b6   : > { %v820_v2 = vsub.f32 %v816_v61, %v819_v1 }
 0x3b8   : > { %v821_v3 = vmul.f32 1.442695, %v820_v2 }
 0x3ba   : > { %2535 = vpow2.f32 %v821_v3 }
 0x3bb   : > { %v888_v6 = vpop.f32.mrf.mxu2 }
 0x3c0   : > { %v2536_v7 = vpop.eup %2535 }
 0x3c1   : > { %v823_v8 = vsel %vm663_vm3, %v2536_v7, 0.0 }
 0x3c2   : > { %824 = vadd.xlane.f32.xlu1 %v823_v8 }
 0x435   : > { %v825_v13 = vpop.xlane.xlu1 %824 }
 0x436   : > { %2537 = vrcp.f32 %v825_v13 }
 0x43c   : > { %v2538_v14 = vpop.eup %2537 }
 0x43d   : > { %v827_v15 = vmul.f32 %v2538_v14, %v2536_v7 }
 0x43f   : > { %v828_v16 = vpack.c.bf16 %v827_v15, %v827_v15 }
 0x441   : > { %2158 = vmatmul.msk.bf16.vlgmr.msra.gmra.mxu0 %vm663_vm3, %v828_v16 }
 0x442   : > { %1035 = vmatpush.bf16.msra.mxu0 %v1026_v38  ;;  %v2587_v38 = vmov 32.0  }
 0x451   : > { %2181 = vmatmul.msk.bf16.vlgmr.msrb.gmra.mxu0 %vm623_vm1, %v2725_v11 }
 0x4be   : > { %v845_v22 = vpop.f32.mrf.mxu0 }
 0x4bf   : > { %v851_v23 = vpack.c.bf16 %v845_v22, %v845_v22 }
 0x4c1   : > { %2160 = vmatmul.msk.bf16.vlgmr.msra.gmra.mxu1 %vm663_vm3, %v851_v23  ;;  %v2222_v23 = vld [vmem:[%s3108_s5 + $0xc] sm:$0xf] }
 0x4c2   : > { %1065 = vmatpush.bf16.msra.mxu1 %v2473_v56  ;;  %v2486_v56 = vld [vmem:[%s3115_s12] sm:$0xff] }
 0x4c6   : > { %v847_v24 = vpop.f32.mrf.mxu0  ;;  %1066 = vmatpush.bf16.msra.mxu1 %v2472_v57 }
 0x4c7   : > { %v1178_v24 = vsel %vm701_vm2, %v2222_v23, 0  ;;  %v2492_v23 = vld [vmem:[%s3117_s14 + $0x10] sm:$0xff] }
 0x4ce   : > { %v938_v25 = vpop.f32.mrf.mxu0 }
 0x4cf   : > { %v965_v26 = vpack.c.bf16 %v938_v25, %v938_v25 }
 0x4d1   : > { %v970_v28 = vsel %vm663_vm3, %v965_v26, 0  ;;  %2188 = vmatmul.msk.bf16.vlgmr.msrb.gmra.mxu1 %vm623_vm1, %v2725_v11 }
 0x4d2   : > { %979 = vmatpush.bf16.xpose.msra.mxu2 %v970_v28 }
 0x4d6   : > { %v940_v30 = vpop.f32.mrf.mxu0 }
 0x4d9   : > { %2189 = vmatmul.msk.bf16.vlgmr.msra.gmra.mxu2 %vm663_vm3, %v964_v29 }
 0x4da   : > { %1088 = vmatpush.bf16.msrb.mxu2 %v2474_v27 }
 0x4de   : > { %1187 = vmatpush.bf16.msra.mxu2 %v1178_v24 }
 0x4e1   : > { %2205 = vmatmul.msk.bf16.vlgmr.msra.gmra.mxu1 %vm563_vm0, %v2710_v5 }
 0x4e9   : > { %2212 = vmatmul.msk.bf16.vlgmr.msrb.gmra.mxu2 %vm623_vm1, %v2725_v11 }
 0x53e   : > { %v867_v33 = vpop.f32.mrf.mxu1 }
 0x53f   : > { %v887_v10 = vadd.f32 %v2773_v0, %v867_v33 }
 0x546   : > { %v869_v34 = vpop.f32.mrf.mxu1 }
 0x54e   : > { %v960_v35 = vpop.f32.mrf.mxu1 }
 0x54f   : > { %v999_v37 = vpack.c.bf16 %v960_v35, %v960_v35 }
 0x551   : > { %v1004_v39 = vsel %vm701_vm2, %v999_v37, 0 }
 0x552   : > { %1013 = vmatpush.bf16.msra.mxu3 %v1004_v39 }
 0x556   : > { %v962_v40 = vpop.f32.mrf.mxu1  ;;  %1110 = vmatpush.bf16.msrb.mxu3 %v2475_v55  ;;  %v2480_v55 = vld [vmem:[%s3113_s10] sm:$0xff] }
 0x55c   : > { %v981_v41 = vpop.f32.mrf.mxu2 }
 0x55d   : > { %v985_v42 = vmul.f32 0.35355338, %v981_v41 }
 0x55e   : > { %v1068_v62 = vpop.f32.mrf.mxu1 }
 0x55f   : > { %v986_v43 = vsel %vm584_vm4, %v985_v42, -1e+30  ;;  %v1116_v6 = vpack.c.bf16 %v1068_v62, %v1068_v62  ;;  %v2494_v62 = vld [vmem:[%s3115_s12 + $0x10] sm:$0xff] }
 0x560   : > { %v987_v44 = vsel %vm663_vm3, %v986_v43, -inf }
 0x561   : > { %988 = vmax.xlane.f32.xlu2 %v987_v44 }
 0x564   : > { %v983_v45 = vpop.f32.mrf.mxu2 }
 0x566   : > { %v1070_v63 = vpop.f32.mrf.mxu1 }
 0x56c   : > { %v1090_v46 = vpop.f32.mrf.mxu2 }
 0x56d   : > { %v1117_v47 = vpack.c.bf16 %v1090_v46, %v1090_v46 }
 0x56f   : > { %v1122_v48 = vsel %vm663_vm3, %v1117_v47, 0 }
 0x570   : > { %1131 = vmatpush.bf16.xpose.msrb.mxu0 %v1122_v48 }
 0x574   : > { %v1092_v49 = vpop.f32.mrf.mxu2 }
 0x575   : > { %v2477_v49 = vld [vmem:[%s3111_s8 + $0x8] sm:$0xff] }
 0x5d4   : > { %v989_v50 = vpop.xlane.xlu2 %988 }
 0x5d5   : > { %v990_v51 = vsub.f32 %v986_v43, %v989_v50  ;;  %v2479_v50 = vld [vmem:[%s3112_s9 + $0x8] sm:$0xff] }
 0x5d7   : > { %v991_v52 = vmul.f32 1.442695, %v990_v51  ;;  %v2481_v51 = vld [vmem:[%s3113_s10 + $0x8] sm:$0xff] }
 0x5d9   : > { %2539 = vpow2.f32 %v991_v52  ;;  %v2487_v52 = vld [vmem:[%s3115_s12 + $0x8] sm:$0xff] }
 0x5da   : > { %1456 = vmatpush.bf16.msrb.mxu2 %v2487_v52 }
 0x5de   : > { %1457 = vmatpush.bf16.msrb.mxu2 %v2486_v56  ;;  %v2498_v56 = vld [vmem:[%s3117_s14 + $0x20] sm:$0xff] }
 0x5df   : > { %v2540_v53 = vpop.eup %2539 }
 0x5e0   : > { %v993_v54 = vsel %vm663_vm3, %v2540_v53, 0.0 }
 0x5e1   : > { %994 = vadd.xlane.f32.xlu2 %v993_v54  ;;  %v2478_v54 = vld [vmem:[%s3112_s9] sm:$0xff] }
 0x654   : > { %v995_v58 = vpop.xlane.xlu2 %994 }
 0x655   : > { %2541 = vrcp.f32 %v995_v58  ;;  %v2489_v58 = vld [vmem:[%s3116_s13 + $0x8] sm:$0xff] }
 0x65b   : > { %v2542_v59 = vpop.eup %2541 }
 0x65c   : > { %v997_v60 = vmul.f32 %v2542_v59, %v2540_v53  ;;  %v2476_v53 = vld [vmem:[%s3111_s8] sm:$0xff]  ;;  %v2495_v59 = vld [vmem:[%s3115_s12 + $0x18] sm:$0xff] }
 0x65e   : > { %v998_v61 = vpack.c.bf16 %v997_v60, %v997_v60 }
 0x660   : > { %2190 = vmatmul.msk.bf16.vlgmr.msra.gmra.mxu3 %vm663_vm3, %v998_v61  ;;  %v2488_v61 = vld [vmem:[%s3116_s13] sm:$0xff] }
 0x661   : > { %1260 = vmatpush.bf16.msra.mxu3 %v2477_v49  ;;  %v2499_v49 = vld [vmem:[%s3117_s14 + $0x28] sm:$0xff] }
 0x665   : > { %1261 = vmatpush.bf16.msra.mxu3 %v2476_v53 }
 0x670   : > { %2219 = vmatmul.msk.bf16.vlgmr.msrb.gmra.mxu3 %vm623_vm1, %v2725_v11  ;;  %vm1534_vm1 = vcmask 523264  }
 0x671   : > { %1481 = vmatpush.bf16.msrb.mxu3 %v2489_v58 }
 0x675   : > { %1482 = vmatpush.bf16.msrb.mxu3 %v2488_v61 }
 0x6e3   : > { %v1015_v1 = vpop.f32.mrf.mxu3 }
 0x6e4   : > { %v1021_v2 = vpack.c.bf16 %v1015_v1, %v1015_v1 }
 0x6e6   : > { %2192 = vmatmul.msk.bf16.vlgmr.msra.gmra.mxu0 %vm663_vm3, %v1021_v2 }
 0x6e7   : > { %1363 = vmatpush.bf16.msra.mxu0 %v2479_v50 }
 0x6eb   : > { %v1017_v3 = vpop.f32.mrf.mxu3  ;;  %1364 = vmatpush.bf16.msra.mxu0 %v2478_v54 }
 0x6f3   : > { %v1112_v7 = vpop.f32.mrf.mxu3 }
 0x6f4   : > { %v1151_v5 = vpack.c.bf16 %v1112_v7, %v1112_v7 }
 0x6f6   : > { %v1156_v8 = vsel %vm701_vm2, %v1151_v5, 0  ;;  %2220 = vmatmul.msk.bf16.vlgmr.msrb.gmra.mxu0 %vm663_vm3, %v1116_v6 }
 0x6f7   : > { %1165 = vmatpush.bf16.msrb.mxu1 %v1156_v8  ;;  %v2527_v8 = vld [vmem:[%s3109_s6] ss:$0 sm:$0xff] }
 0x6fb   : > { %v1114_v9 = vpop.f32.mrf.mxu3  ;;  %1388 = vmatpush.bf16.msra.mxu1 %v2481_v51 }
 0x6ff   : > { %1389 = vmatpush.bf16.msra.mxu1 %v2480_v55 }
 0x763   : > { %v1037_v12 = vpop.f32.mrf.mxu0 }
 0x764   : > { %v1041_v11 = vadd.f32 %v1037_v12, %v887_v10  ;;  %v2528_v10 = vld [vmem:[%s3110_s7] ss:$0 sm:$0xff] }
 0x76b   : > { %v1039_v13 = vpop.f32.mrf.mxu0 }
 0x773   : > { %v1133_v14 = vpop.f32.mrf.mxu0 }
 0x774   : > { %v1137_v15 = vmul.f32 0.35355338, %v1133_v14 }
 0x776   : > { %v1138_v16 = vsel %vm584_vm4, %v1137_v15, -1e+30  ;;  %v2497_v15 = vld [vmem:[%s3116_s13 + $0x18] sm:$0xff] }
 0x777   : > { %v1139_v17 = vsel %vm663_vm3, %v1138_v16, -inf }
 0x778   : > { %1140 = vmax.xlane.f32.xlu0 %v1139_v17  ;;  %v2496_v17 = vld [vmem:[%s3116_s13 + $0x10] sm:$0xff] }
 0x77b   : > { %v1135_v18 = vpop.f32.mrf.mxu0 }
 0x77c   : > { %v2504_v18 = vld [vmem:[%s3116_s13 + $0x20] sm:$0xff] }
 0x7eb   : > { %v1141_v19 = vpop.xlane.xlu0 %1140 }
 0x7ec   : > { %v1142_v20 = vsub.f32 %v1138_v16, %v1141_v19  ;;  %v2505_v16 = vld [vmem:[%s3116_s13 + $0x28] sm:$0xff]  ;;  %v2485_v19 = vld [vmem:[%s3114_s11 + $0x18] sm:$0xff] }
 0x7ee   : > { %v1143_v21 = vmul.f32 1.442695, %v1142_v20  ;;  %v2484_v20 = vld [vmem:[%s3114_s11 + $0x10] sm:$0xff] }
 0x7f0   : > { %2543 = vpow2.f32 %v1143_v21  ;;  %v2493_v21 = vld [vmem:[%s3117_s14 + $0x18] sm:$0xff] }
 0x7f1   : > { %1542 = vmatpush.bf16.msrb.mxu0 %v2493_v21 }
 0x7f5   : > { %1543 = vmatpush.bf16.msrb.mxu0 %v2492_v23  ;;  %v2512_v23 = vld [vmem:[%s3116_s13 + $0x30] sm:$0xff] }
 0x7f6   : > { %v2544_v22 = vpop.eup %2543 }
 0x7f7   : > { %v1145_v0 = vsel %vm663_vm3, %v2544_v22, 0.0 }
 0x7f8   : > { %1146 = vadd.xlane.f32.xlu1 %v1145_v0 }
 0x86b   : > { %v1147_v31 = vpop.xlane.xlu1 %1146 }
 0x86c   : > { %2545 = vrcp.f32 %v1147_v31 }
 0x86d   : > { %2547 = vrcp.f32 %v2587_v38 }
 0x872   : > { %v2546_v25 = vpop.eup %2545 }
 0x873   : > { %v1149_v26 = vmul.f32 %v2546_v25, %v2544_v22  ;;  %v2548_v39 = vpop.eup %2547  ;;  %v2483_v22 = vld [vmem:[%s3114_s11 + $0x8] sm:$0xff]  ;;  %v2482_v25 = vld [vmem:[%s3114_s11] sm:$0xff] }
 0x874   : > { %v1201_v40 = vmul.f32 32.0, %v2548_v39  ;;  %vm1205_vm5 = vweird.f32 %v2548_v39 }
 0x875   : > { %v1150_v27 = vpack.c.bf16 %v1149_v26, %v1149_v26 }
 0x876   : > { %v1202_v41 = vsub.f32 1.0, %v1201_v40  ;;  %v2501_v40 = vld [vmem:[%s3117_s14 + $0x38] sm:$0xff] }
 0x877   : > { %2221 = vmatmul.msk.bf16.vlgmr.msrb.gmra.mxu1 %vm663_vm3, %v1150_v27  ;;  %v2491_v27 = vld [vmem:[%s3117_s14 + $0x8] sm:$0xff] }
 0x878   : > { %v1203_v42 = vmul.f32 %v2548_v39, %v1202_v41  ;;  %1583 = vmatpush.bf16.msrb.mxu1 %v2485_v19  ;;  %1544 = vmatpush.bf16.msrb.mxu0 %v2491_v27 }
 0x87a   : > { %v1204_v43 = vadd.f32 %v2548_v39, %v1203_v42  ;;  %v2503_v42 = vld [vmem:[%s3115_s12 + $0x28] sm:$0xff] }
 0x87c   : > { %v2849_v44 = vsel %vm1205_vm5, %v2548_v39, %v1204_v43  ;;  %1584 = vmatpush.bf16.msrb.mxu1 %v2484_v20 }
 0x880   : > { %1585 = vmatpush.bf16.msrb.mxu1 %v2483_v22 }
 0x884   : > { %1586 = vmatpush.bf16.msrb.mxu1 %v2482_v25  ;;  %v2511_v25 = vld [vmem:[%s3115_s12 + $0x38] sm:$0xff] }
 0x8f4   : > { %v1167_v28 = vpop.f32.mrf.mxu1 }
 0x8f5   : > { %v1173_v29 = vpack.c.bf16 %v1167_v28, %v1167_v28 }
 0x8f7   : > { %2223 = vmatmul.msk.bf16.vlgmr.msra.gmra.mxu2 %vm663_vm3, %v1173_v29 }
 0x8f8   : > { %1634 = vmatpush.bf16.msra.mxu2 %v2495_v59 }
 0x8fc   : > { %v1169_v30 = vpop.f32.mrf.mxu1  ;;  %1635 = vmatpush.bf16.msra.mxu2 %v2494_v62 }
 0x97a   : > { %v1189_v33 = vpop.f32.mrf.mxu2 }
 0x97b   : > { %v1193_v34 = vadd.f32 %v1189_v33, %v1041_v11 }
 0x97d   : > { %v1194_v35 = vadd.f32 %v1193_v34, %v2706_v4 }
 0x97f   : > { %v1197_v36 = vsel %vm563_vm0, %v1194_v35, 0.0 }
 0x980   : > { %1198 = vadd.xlane.f32.xlu2 %v1197_v36 }
 0x982   : > { %v1191_v37 = vpop.f32.mrf.mxu2 }
 0x9f3   : > { %v1199_v45 = vpop.xlane.xlu2 %1198 }
 0x9f4   : > { %v1207_v46 = vmul.f32 %v2849_v44, %v1199_v45  ;;  %v2500_v45 = vld [vmem:[%s3117_s14 + $0x30] sm:$0xff] }
 0x9f6   : > { %v1208_v47 = vsub.f32 %v1194_v35, %v1207_v46  ;;  %v2490_v35 = vld [vmem:[%s3117_s14] sm:$0xff] }
 0x9f7   : > { %1545 = vmatpush.bf16.msrb.mxu0 %v2490_v35 }
 0x9f8   : > { %v1209_v48 = vmul.f32 %v1208_v47, %v1208_v47 }
 0x9fa   : > { %v1210_v4 = vsel %vm563_vm0, %v1209_v48, 0.0 }
 0x9fb   : > { %1211 = vadd.xlane.f32.xlu0 %v1210_v4 }
 0xa6e   : > { %v1212_v57 = vpop.xlane.xlu0 %1211 }
 0xa6f   : > { %v1213_v60 = vmul.f32 %v1212_v57, %v2849_v44 }
 0xa71   : > { %v1214_v63 = vadd.f32 1e-05, %v1213_v60 }
 0xa73   : > { %2549 = vrsqrt.f32 %v1214_v63  ;;  %vm1221_vm7 = vweird.f32 %v1214_v63 }
 0xa79   : > { %v2550_v1 = vpop.eup %2549 }
 0xa7a   : > { %v1216_v2 = vmul.f32 %v2550_v1, %v1214_v63  ;;  %vm1222_vm6 = vweird.f32 %v2550_v1 }
 0xa7b   : > { %vm1223_vm8 = vmor %vm1221_vm7, %vm1222_vm6 }
 0xa7c   : > { %v1217_v3 = vmul.f32 %v2550_v1, %v1216_v2 }
 0xa7e   : > { %v1218_v6 = vmul.f32 0.5, %v1217_v3 }
 0xa80   : > { %v1219_v7 = vsub.f32 1.5, %v1218_v6 }
 0xa82   : > { %v1220_v5 = vmul.f32 %v2550_v1, %v1219_v7 }
 0xa84   : > { %v1224_v9 = vsel %vm1223_vm8, %v2550_v1, %v1220_v5 }
 0xa85   : > { %v1225_v12 = vmul.f32 %v1224_v9, %v1208_v47  ;;  %v2502_v47 = vld [vmem:[%s3115_s12 + $0x20] sm:$0xff] }
 0xa87   : > { %v1229_v11 = vmul.f32 %v2527_v8, %v1225_v12 }
 0xa89   : > { %v2896_v13 = vadd.f32 %v2528_v10, %v1229_v11 }
 0xa8b   : > { %v2900_v14 = vpack.c.bf16 %v2896_v13, %v2896_v13 }
 0xa8d   : > { %2232 = vmatmul.msk.bf16.vlgmr.msra.gmra.mxu3 %vm563_vm0, %v2900_v14  ;;  %2241 = vmatmul.msk.bf16.vlgmr.msra.gmra.mxu0 %vm563_vm0, %v2900_v14 }
 0xa8e   : > { %2250 = vmatmul.msk.bf16.vlgmr.msra.gmra.mxu1 %vm563_vm0, %v2900_v14  ;;  %2259 = vmatmul.msk.bf16.vlgmr.msrb.gmra.mxu2 %vm563_vm0, %v2900_v14 }
 0xa8f   : > { %1659 = vmatpush.bf16.msra.mxu3 %v2497_v15  ;;  %1797 = vmatpush.bf16.msrb.mxu2 %v2505_v16  ;;  %v2513_v16 = vld [vmem:[%s3116_s13 + $0x38] sm:$0xff] }
 0xa90   : > { %1719 = vmatpush.bf16.msra.mxu0 %v2501_v40  ;;  %1772 = vmatpush.bf16.msra.mxu1 %v2503_v42 }
 0xa93   : > { %1660 = vmatpush.bf16.msra.mxu3 %v2496_v17  ;;  %1798 = vmatpush.bf16.msrb.mxu2 %v2504_v18 }
 0xa94   : > { %1720 = vmatpush.bf16.msra.mxu0 %v2500_v45  ;;  %1773 = vmatpush.bf16.msra.mxu1 %v2502_v47 }
 0xa98   : > { %1721 = vmatpush.bf16.msra.mxu0 %v2499_v49 }
 0xa9c   : > { %1722 = vmatpush.bf16.msra.mxu0 %v2498_v56 }
 0xa9d   : > { %2268 = vmatmul.msk.bf16.vlgmr.msrb.gmra.mxu3 %vm563_vm0, %v2900_v14 }
 0xa9e   : > { %2327 = vmatmul.msk.bf16.vlgmr.msra.gmra.mxu2 %vm563_vm0, %v2900_v14 }
 0xaad   : > { %2336 = vmatmul.msk.bf16.vlgmr.msra.gmra.mxu3 %vm563_vm0, %v2900_v14 }
 0xaae   : > { %2387 = vmatmul.msk.bf16.vlgmr.msrb.gmra.mxu2 %vm563_vm0, %v2900_v14 }
 0xb0a   : > { %v2942_v0 = vpop.f32.mrf.mxu0 }
 0xb0b   : > { %v1395_v24 = vsub.f32 0.0, %v2942_v0  ;;  %v2948_v31 = vpop.f32.mrf.mxu1 }
 0xb0d   : > { %v1396_v26 = vmul.f32 1.442695, %v1395_v24 }
 0xb0f   : > { %2551 = vpow2.f32 %v1396_v26 }
 0xb10   : > { %v2956_v28 = vpop.f32.mrf.mxu3 }
 0xb11   : > { %v2958_v29 = vpop.f32.mrf.mxu2  ;;  %v1268_v30 = vsel %vm1267_vm9, %v2956_v28, -inf }
 0xb12   : > { %v1488_v33 = vsub.f32 0.0, %v2958_v29  ;;  %1269 = vmax.xlane.f32.xlu1 %v1268_v30  ;;  %v1368_v34 = vpop.f32.mrf.mxu0 }
 0xb13   : > { %v1393_v36 = vpop.f32.mrf.mxu1 }
 0xb14   : > { %v1489_v37 = vmul.f32 1.442695, %v1488_v33 }
 0xb15   : > { %v2552_v38 = vpop.eup %2551 }
 0xb16   : > { %v1398_v39 = vadd.f32 1.0, %v2552_v38  ;;  %2553 = vpow2.f32 %v1489_v37 }
 0xb18   : > { %2555 = vrcp.f32 %v1398_v39  ;;  %v1265_v41 = vpop.f32.mrf.mxu3  ;;  %v1410_v54 = vand.u32 2147483648, %v1398_v39  ;;  %v1408_v58 = vand.u32 2147483647, %v1398_v39  ;;  %vm1404_vm11 = vweird.f32 %v1398_v39 }
 0xb19   : > { %v1461_v43 = vpop.f32.mrf.mxu2 }
 0xb1a   : > { %v1411_v62 = vor.u32 1.1754944e-38, %v1410_v54  ;;  %vm1409_vm13 = vcmp.eq.f32.partialorder %v1408_v58, 8.507059e+37  ;;  %v2507_v54 = vld [vmem:[%s3117_s14 + $0x48] sm:$0xff]  ;;  %v2506_v58 = vld [vmem:[%s3117_s14 + $0x40] sm:$0xff] }
 0xb1c   : > { %v2554_v46 = vpop.eup %2553 }
 0xb1d   : > { %v1491_v48 = vadd.f32 1.0, %v2554_v46 }
 0xb1e   : > { %v2556_v4 = vpop.eup %2555 }
 0xb1f   : > { %v1400_v50 = vmul.f32 %v2556_v4, %v1398_v39  ;;  %2557 = vrcp.f32 %v1491_v48  ;;  %vm1405_vm10 = vweird.f32 %v2556_v4  ;;  %v1503_v5 = vand.u32 2147483648, %v1491_v48 }
 0xb20   : > { %v1484_v51 = vpop.f32.mrf.mxu3  ;;  %vm1406_vm12 = vmor %vm1404_vm11, %vm1405_vm10  ;;  %v1501_v10 = vand.u32 2147483647, %v1491_v48  ;;  %vm1497_vm15 = vweird.f32 %v1491_v48 }
 0xb21   : > { %v1401_v52 = vsub.f32 1.0, %v1400_v50  ;;  %v2981_v53 = vpop.f32.mrf.mxu2  ;;  %v1504_v18 = vor.u32 1.1754944e-38, %v1503_v5  ;;  %v2515_v5 = vld [vmem:[%s3117_s14 + $0x68] sm:$0xff] }
 0xb22   : > { %v1666_v55 = vsub.f32 0.0, %v2981_v53  ;;  %vm1502_vm3 = vcmp.eq.f32.partialorder %v1501_v10, 8.507059e+37 }
 0xb23   : > { %v1402_v57 = vmul.f32 %v2556_v4, %v1401_v52  ;;  %v2509_v52 = vld [vmem:[%s3117_s14 + $0x58] sm:$0xff] }
 0xb24   : > { %v1667_v59 = vmul.f32 1.442695, %v1666_v55  ;;  %1857 = vmatpush.bf16.msrb.mxu3 %v2509_v52 }
 0xb25   : > { %v2558_v60 = vpop.eup %2557  ;;  %v1403_v61 = vadd.f32 %v2556_v4, %v1402_v57 }
 0xb26   : > { %v1493_v63 = vmul.f32 %v2558_v60, %v1491_v48  ;;  %2559 = vpow2.f32 %v1667_v59  ;;  %vm1498_vm14 = vweird.f32 %v2558_v60 }
 0xb27   : > { %v1407_v1 = vsel %vm1406_vm12, %v2556_v4, %v1403_v61  ;;  %vm1499_vm2 = vmor %vm1497_vm15, %vm1498_vm14 }
 0xb28   : > { %v1412_v2 = vsel %vm1409_vm13, %v1411_v62, %v1407_v1  ;;  %v1494_v3 = vsub.f32 1.0, %v1493_v63  ;;  %v1486_v6 = vpop.f32.mrf.mxu3  ;;  %v2517_v1 = vld [vmem:[%s3117_s14 + $0x78] sm:$0xff] }
 0xb29   : > { %v1414_v7 = vmul.f32 %v1412_v2, %v2942_v0  ;;  %v1639_v8 = vpop.f32.mrf.mxu2  ;;  %1995 = vmatpush.bf16.msra.mxu2 %v2517_v1  ;;  %v2516_v6 = vld [vmem:[%s3117_s14 + $0x70] sm:$0xff] }
 0xb2a   : > { %v1495_v9 = vmul.f32 %v2558_v60, %v1494_v3 }
 0xb2b   : > { %v1415_v12 = vmul.f32 %v1414_v7, %v2948_v31 }
 0xb2c   : > { %v2560_v11 = vpop.eup %2559  ;;  %v1496_v15 = vadd.f32 %v2558_v60, %v1495_v9 }
 0xb2d   : > { %v1416_v17 = vpack.c.bf16 %v1415_v12, %v1415_v12  ;;  %v1669_v19 = vadd.f32 1.0, %v2560_v11  ;;  %1996 = vmatpush.bf16.msra.mxu2 %v2516_v6 }
 0xb2e   : > { %v1500_v20 = vsel %vm1499_vm2, %v2558_v60, %v1496_v15 }
 0xb2f   : > { %v1505_v21 = vsel %vm1502_vm3, %v1504_v18, %v1500_v20  ;;  %2561 = vrcp.f32 %v1669_v19  ;;  %2302 = vmatmul.msk.bf16.vlgmr.msrb.gmra.mxu1 %vm1534_vm1, %v1416_v17  ;;  %v1681_v35 = vand.u32 2147483648, %v1669_v19  ;;  %v1679_v38 = vand.u32 2147483647, %v1669_v19 }
 0xb30   : > { %v1507_v22 = vmul.f32 %v1505_v21, %v2958_v29  ;;  %v1662_v0 = vpop.f32.mrf.mxu3  ;;  %1935 = vmatpush.bf16.msrb.mxu1 %v2513_v16  ;;  %v2510_v29 = vld [vmem:[%s3115_s12 + $0x30] sm:$0xff]  ;;  %vm1675_vm5 = vweird.f32 %v1669_v19  ;;  %v2514_v16 = vld [vmem:[%s3117_s14 + $0x60] sm:$0xff] }
 0xb31   : > { %v2997_v24 = vpop.f32.mrf.mxu2  ;;  %v1682_v40 = vor.u32 1.1754944e-38, %v1681_v35  ;;  %vm1680_vm7 = vcmp.eq.f32.partialorder %v1679_v38, 8.507059e+37  ;;  %1997 = vmatpush.bf16.msra.mxu2 %v2515_v5 }
 0xb32   : > { %v1508_v31 = vmul.f32 %v1507_v22, %v1484_v51 }
 0xb34   : > { %v1509_v26 = vpack.c.bf16 %v1508_v31, %v1508_v31  ;;  %1936 = vmatpush.bf16.msrb.mxu1 %v2512_v23 }
 0xb35   : > { %v2562_v27 = vpop.eup %2561  ;;  %1998 = vmatpush.bf16.msra.mxu2 %v2514_v16 }
 0xb36   : > { %v1671_v30 = vmul.f32 %v2562_v27, %v1669_v19  ;;  %2285 = vmatmul.msk.bf16.vlgmr.msrb.gmra.mxu0 %vm1534_vm1, %v1509_v26  ;;  %vm1676_vm4 = vweird.f32 %v2562_v27 }
 0xb37   : > { %1910 = vmatpush.bf16.msrb.mxu0 %v2511_v25  ;;  %vm1677_vm6 = vmor %vm1675_vm5, %vm1676_vm4 }
 0xb38   : > { %v1672_v33 = vsub.f32 1.0, %v1671_v30  ;;  %v1664_v34 = vpop.f32.mrf.mxu3 }
 0xb39   : > { %v1802_v36 = vpop.f32.mrf.mxu2 }
 0xb3a   : > { %v1673_v37 = vmul.f32 %v2562_v27, %v1672_v33 }
 0xb3b   : > { %1911 = vmatpush.bf16.msrb.mxu0 %v2510_v29 }
 0xb3c   : > { %v1674_v39 = vadd.f32 %v2562_v27, %v1673_v37 }
 0xb3e   : > { %v1678_v41 = vsel %vm1677_vm6, %v2562_v27, %v1674_v39 }
 0xb3f   : > { %v1683_v42 = vsel %vm1680_vm7, %v1682_v40, %v1678_v41  ;;  %2378 = vmatmul.msk.bf16.vlgmr.msra.gmra.mxu1 %vm563_vm0, %v2900_v14 }
 0xb40   : > { %v1685_v43 = vmul.f32 %v1683_v42, %v2981_v53 }
 0xb42   : > { %v1686_v45 = vmul.f32 %v1685_v43, %v1662_v0 }
 0xb44   : > { %v1687_v46 = vpack.c.bf16 %v1686_v45, %v1686_v45 }
 0xb46   : > { %2353 = vmatmul.msk.bf16.vlgmr.msra.gmra.mxu0 %vm1534_vm1, %v1687_v46 }
 0xb4f   : > { %2438 = vmatmul.msk.bf16.vlgmr.msrb.gmra.mxu1 %vm563_vm0, %v2900_v14 }
 0xb56   : > { %2429 = vmatmul.msk.bf16.vlgmr.msrb.gmra.mxu0 %vm563_vm0, %v2900_v14 }
 0xb85   : > { %v1270_v47 = vpop.xlane.xlu1 %1269 }
 0xb86   : > { %v1271_v48 = vsub.f32 %v2956_v28, %v1270_v47  ;;  %v2508_v28 = vld [vmem:[%s3117_s14 + $0x50] sm:$0xff] }
 0xb87   : > { %1858 = vmatpush.bf16.msrb.mxu3 %v2508_v28 }
 0xb88   : > { %v1272_v4 = vmul.f32 1.442695, %v1271_v48 }
 0xb8a   : > { %2563 = vpow2.f32 %v1272_v4 }
 0xb8b   : > { %1859 = vmatpush.bf16.msrb.mxu3 %v2507_v54 }
 0xb8f   : > { %1860 = vmatpush.bf16.msrb.mxu3 %v2506_v58 }
 0xb90   : > { %v3015_v49 = vpop.eup %2563 }
 0xb91   : > { %v1274_v50 = vsel %vm1267_vm9, %v3015_v49, 0.0 }
 0xb92   : > { %1275 = vadd.xlane.f32.xlu2 %v1274_v50 }
 0xbac   : > { %v3019_v51 = vpop.f32.mrf.mxu1 }
 0xbb3   : > { %v3024_v53 = vpop.f32.mrf.mxu0 }
 0xbb4   : > { %v1590_v14 = vpop.f32.mrf.mxu1 }
 0xbbb   : > { %v1549_v55 = vpop.f32.mrf.mxu0 }
 0xbbc   : > { %v1775_v56 = vpop.f32.mrf.mxu1 }
 0xbbd   : > { %v1804_v57 = vsub.f32 0.0, %v1775_v56 }
 0xbbf   : > { %v1805_v59 = vmul.f32 1.442695, %v1804_v57 }
 0xbc1   : > { %2565 = vpow2.f32 %v1805_v59 }
 0xbc3   : > { %v3035_v60 = vpop.f32.mrf.mxu0 }
 0xbc4   : > { %v1777_v61 = vpop.f32.mrf.mxu1 }
 0xbc7   : > { %v2566_v62 = vpop.eup %2565 }
 0xbc8   : > { %v1807_v63 = vadd.f32 1.0, %v2566_v62 }
 0xbca   : > { %2567 = vrcp.f32 %v1807_v63  ;;  %v1819_v12 = vand.u32 2147483648, %v1807_v63  ;;  %v1817_v18 = vand.u32 2147483647, %v1807_v63  ;;  %vm1813_vm10 = vweird.f32 %v1807_v63 }
 0xbcb   : > { %v1726_v2 = vpop.f32.mrf.mxu0 }
 0xbcc   : > { %v1938_v3 = vpop.f32.mrf.mxu1  ;;  %v1820_v21 = vor.u32 1.1754944e-38, %v1819_v12  ;;  %vm1818_vm12 = vcmp.eq.f32.partialorder %v1817_v18, 8.507059e+37 }
 0xbd0   : > { %v2568_v7 = vpop.eup %2567 }
 0xbd1   : > { %v1809_v8 = vmul.f32 %v2568_v7, %v1807_v63  ;;  %vm1814_vm8 = vweird.f32 %v2568_v7 }
 0xbd2   : > { %vm1815_vm11 = vmor %vm1813_vm10, %vm1814_vm8  ;;  %vm1730_vm10 = vcmp.eq.s32.totalorder %v2752_v32, 2 }
 0xbd3   : > { %v1810_v9 = vsub.f32 1.0, %v1809_v8  ;;  %v1913_v10 = vpop.f32.mrf.mxu0 }
 0xbd4   : > { %v1942_v11 = vsub.f32 0.0, %v1913_v10  ;;  %v1940_v15 = vpop.f32.mrf.mxu1 }
 0xbd5   : > { %v1811_v17 = vmul.f32 %v2568_v7, %v1810_v9 }
 0xbd6   : > { %v1943_v19 = vmul.f32 1.442695, %v1942_v11 }
 0xbd7   : > { %v1812_v20 = vadd.f32 %v2568_v7, %v1811_v17 }
 0xbd8   : > { %2569 = vpow2.f32 %v1943_v19 }
 0xbd9   : > { %v1816_v22 = vsel %vm1815_vm11, %v2568_v7, %v1812_v20  ;;  %vm1592_vm11 = vcmp.eq.s32.totalorder %v2752_v32, 1 }
 0xbda   : > { %v1821_v0 = vsel %vm1818_vm12, %v1820_v21, %v1816_v22  ;;  %vm1417_vm12 = vcmp.eq.s32.totalorder %v2752_v32, 0 }
 0xbdb   : > { %v1823_v23 = vmul.f32 %v1821_v0, %v1775_v56  ;;  %v1915_v31 = vpop.f32.mrf.mxu0 }
 0xbdd   : > { %v1824_v25 = vmul.f32 %v1823_v23, %v2997_v24 }
 0xbde   : > { %v2570_v26 = vpop.eup %2569 }
 0xbdf   : > { %v1825_v27 = vpack.c.bf16 %v1824_v25, %v1824_v25  ;;  %v1945_v30 = vadd.f32 1.0, %v2570_v26 }
 0xbe1   : > { %2571 = vrcp.f32 %v1945_v30  ;;  %2404 = vmatmul.msk.bf16.vlgmr.msrb.gmra.mxu3 %vm1534_vm1, %v1825_v27  ;;  %v1957_v35 = vand.u32 2147483648, %v1945_v30  ;;  %v1955_v37 = vand.u32 2147483647, %v1945_v30  ;;  %vm1951_vm14 = vweird.f32 %v1945_v30 }
 0xbe3   : > { %v1958_v39 = vor.u32 1.1754944e-38, %v1957_v35  ;;  %vm1956_vm2 = vcmp.eq.f32.partialorder %v1955_v37, 8.507059e+37 }
 0xbe7   : > { %v2572_v29 = vpop.eup %2571 }
 0xbe8   : > { %v1947_v33 = vmul.f32 %v2572_v29, %v1945_v30  ;;  %vm1952_vm13 = vweird.f32 %v2572_v29 }
 0xbe9   : > { %vm1953_vm15 = vmor %vm1951_vm14, %vm1952_vm13  ;;  %vm1868_vm13 = vcmp.eq.s32.totalorder %v2752_v32, 3 }
 0xbea   : > { %v1948_v34 = vsub.f32 1.0, %v1947_v33 }
 0xbec   : > { %v1949_v36 = vmul.f32 %v2572_v29, %v1948_v34 }
 0xbee   : > { %v1950_v38 = vadd.f32 %v2572_v29, %v1949_v36 }
 0xbf0   : > { %v1954_v40 = vsel %vm1953_vm15, %v2572_v29, %v1950_v38 }
 0xbf1   : > { %v1959_v24 = vsel %vm1956_vm2, %v1958_v39, %v1954_v40 }
 0xbf2   : > { %v1961_v41 = vmul.f32 %v1959_v24, %v1913_v10 }
 0xbf4   : > { %v1962_v42 = vmul.f32 %v1961_v41, %v1938_v3 }
 0xbf6   : > { %v1963_v43 = vpack.c.bf16 %v1962_v42, %v1962_v42 }
 0xbf8   : > { %2455 = vmatmul.msk.bf16.vlgmr.msra.gmra.mxu2 %vm1534_vm1, %v1963_v43 }
 0xc05   : > { %v1276_v45 = vpop.xlane.xlu2 %1275 }
 0xc06   : > { %2573 = vrcp.f32 %v1276_v45 }
 0xc0c   : > { %v2574_v46 = vpop.eup %2573 }
 0xc0d   : > { %v1278_v47 = vmul.f32 %v2574_v46, %v3015_v49 }
 0xc0f   : > { %v1279_v48 = vsel %vm1267_vm9, %v1278_v47, -inf }
 0xc10   : > { %1280 = vmax.xlane.f32.xlu0 %v1279_v48 }
 0xc64   : > { %v3054_v4 = vpop.f32.mrf.mxu3 }
 0xc6c   : > { %v1864_v50 = vpop.f32.mrf.mxu3 }
 0xc7b   : > { %v3056_v52 = vpop.f32.mrf.mxu2 }
 0xc83   : > { %v2002_v14 = vpop.f32.mrf.mxu2  ;;  %v1281_v28 = vpop.xlane.xlu0 %1280 }
 0xc84   : > { %vm1282_vm3 = vcmp.ge.f32.partialorder %v1278_v47, %v1281_v28 }
 0xc85   : > { %v1283_v54 = vsel %vm1282_vm3, %v2752_v32, 4 }
 0xc86   : > { %v1284_v55 = vsel %vm1267_vm9, %v1283_v54, 2147483647 }
 0xc87   : > { %v1286_v56 = vshra.s32 %v1284_v55, 16  ;;  %v1285_v58 = vand.u32 65535, %v1284_v55 }
 0xc89   : > { %v1288_v57 = vcvt.s32.f32 %v1286_v56  ;;  %v1287_v59 = vcvt.s32.f32 %v1285_v58 }
 0xc8b   : > { %1289 = vmin.xlane.f32.xlu1 %v1288_v57 }
 0xcfe   : > { %v1290_v49 = vpop.xlane.xlu1 %1289 }
 0xcff   : > { %vm1291_vm1 = vcmp.eq.f32.partialorder %v1288_v57, %v1290_v49  ;;  %v1296_v62 = vcvt.f32.s32 %v1290_v49 }
 0xd00   : > { %v1292_v61 = vsel %vm1291_vm1, %v1287_v59, inf }
 0xd01   : > { %1293 = vmin.xlane.f32.xlu2 %v1292_v61  ;;  %v1297_v1 = vshll.u32 %v1296_v62, 16  ;;  %v2529_v61 = vld [vmem:[%s3118_s15] ss:$0 sm:$0xff] }
 0xd74   : > { %v1294_v63 = vpop.xlane.xlu2 %1293 }
 0xd75   : > { %v1295_v2 = vcvt.f32.s32 %v1294_v63 }
 0xd77   : > { %v1298_v3 = vadd.s32 %v1297_v1, %v1295_v2 }
 0xd79   : > { %vm1299_vm4 = vcmp.eq.s32.totalorder %v2752_v32, %v1298_v3 }
 0xd7a   : > { %v1300_v6 = vsel %vm1299_vm4, -1.0, %v1278_v47 }
 0xd7b   : > { %v1301_v7 = vsel %vm1267_vm9, %v1300_v6, -inf }
 0xd7c   : > { %1302 = vmax.xlane.f32.xlu0 %v1301_v7 }
 0xdef   : > { %v1303_v5 = vpop.xlane.xlu0 %1302 }
 0xdf0   : > { %vm1304_vm5 = vcmp.ge.f32.partialorder %v1300_v6, %v1303_v5 }
 0xdf1   : > { %v1305_v8 = vsel %vm1304_vm5, %v2752_v32, 4 }
 0xdf2   : > { %v1306_v9 = vsel %vm1267_vm9, %v1305_v8, 2147483647 }
 0xdf3   : > { %v1308_v10 = vshra.s32 %v1306_v9, 16  ;;  %v1307_v11 = vand.u32 65535, %v1306_v9 }
 0xdf5   : > { %v1310_v12 = vcvt.s32.f32 %v1308_v10  ;;  %v1309_v16 = vcvt.s32.f32 %v1307_v11 }
 0xdf7   : > { %1311 = vmin.xlane.f32.xlu1 %v1310_v12 }
 0xe6a   : > { %v1312_v15 = vpop.xlane.xlu1 %1311 }
 0xe6b   : > { %vm1313_vm6 = vcmp.eq.f32.partialorder %v1310_v12, %v1312_v15  ;;  %v1318_v18 = vcvt.f32.s32 %v1312_v15 }
 0xe6c   : > { %v1314_v17 = vsel %vm1313_vm6, %v1309_v16, inf }
 0xe6d   : > { %1315 = vmin.xlane.f32.xlu2 %v1314_v17  ;;  %v1319_v20 = vshll.u32 %v1318_v18, 16 }
 0xee0   : > { %v1316_v19 = vpop.xlane.xlu2 %1315 }
 0xee1   : > { %v1317_v21 = vcvt.f32.s32 %v1316_v19 }
 0xee3   : > { %v1320_v22 = vadd.s32 %v1319_v20, %v1317_v21 }
 0xee5   : > { %vm1321_vm7 = vcmp.eq.s32.totalorder %v2752_v32, %v1320_v22 }
 0xee6   : > { %vm1322_vm8 = vmor %vm1299_vm4, %vm1321_vm7 }
 0xee7   : > { %v1323_v0 = vsel %vm1322_vm8, %v1278_v47, 0.0 }
 0xee8   : > { %v1324_v23 = vsel %vm1267_vm9, %v1323_v0, 0.0 }
 0xee9   : > { %1325 = vadd.xlane.f32.xlu0 %v1324_v23 }
 0xf5c   : > { %v1326_v31 = vpop.xlane.xlu0 %1325 }
 0xf5d   : > { %2575 = vrcp.f32 %v1326_v31 }
 0xf63   : > { %v2576_v25 = vpop.eup %2575 }
 0xf64   : > { %v1328_v26 = vmul.f32 %v2576_v25, %v1323_v0 }
 0xf66   : > { %v1731_v27 = vsel %vm1730_vm10, %v1328_v26, 0.0  ;;  %v1593_v30 = vsel %vm1592_vm11, %v1328_v26, 0.0  ;;  %v1418_v29 = vsel %vm1417_vm12, %v1328_v26, 0.0  ;;  %v1869_v36 = vsel %vm1868_vm13, %v1328_v26, 0.0 }
 0xf67   : > { %v1732_v33 = vsel %vm1267_vm9, %v1731_v27, 0.0  ;;  %v1594_v34 = vsel %vm1267_vm9, %v1593_v30, 0.0  ;;  %v1419_v35 = vsel %vm1267_vm9, %v1418_v29, 0.0  ;;  %v1870_v37 = vsel %vm1267_vm9, %v1869_v36, 0.0 }
 0xf68   : > { %1733 = vadd.xlane.f32.xlu0 %v1732_v33  ;;  %1595 = vadd.xlane.f32.xlu2 %v1594_v34 }
 0xf69   : > { %1420 = vadd.xlane.f32.xlu1 %v1419_v35 }
 0xf71   : > { %1871 = vadd.xlane.f32.xlu1 %v1870_v37 }
 0xfdb   : > { %v1596_v38 = vpop.xlane.xlu2 %1595  ;;  %v1734_v42 = vpop.xlane.xlu0 %1733 }
 0xfdc   : > { %v1421_v39 = vpop.xlane.xlu1 %1420  ;;  %v1728_v24 = vmul.f32 %v3035_v60, %v1596_v38  ;;  %v1866_v45 = vmul.f32 %v3054_v4, %v1734_v42 }
 0xfdd   : > { %v1551_v40 = vmul.f32 %v3024_v53, %v1421_v39 }
 0xfdf   : > { %v1589_v41 = vadd.f32 %v3019_v51, %v1551_v40 }
 0xfe1   : > { %v1729_v43 = vadd.f32 %v1728_v24, %v1589_v41 }
 0xfe3   : > { %v1867_v47 = vadd.f32 %v1866_v45, %v1729_v43 }
 0xfe4   : > { %v1872_v46 = vpop.xlane.xlu1 %1871 }
 0xfe5   : > { %v2004_v32 = vmul.f32 %v3056_v52, %v1872_v46 }
 0xfe7   : > { %v2005_v48 = vadd.f32 %v2004_v32, %v1867_v47 }
 0xfe9   : > { %v2006_v50 = vadd.f32 %v2005_v48, %v2896_v13 }
 0xfeb   : > { %v2009_v14 = vsel %vm563_vm0, %v2006_v50, 0.0 }
 0xfec   : > { %2010 = vadd.xlane.f32.xlu2 %v2009_v14 }
0x105f   : > { %v2011_v28 = vpop.xlane.xlu2 %2010 }
0x1060   : > { %v2012_v53 = vmul.f32 %v2011_v28, %v2849_v44 }
0x1062   : > { %v2013_v60 = vsub.f32 %v2006_v50, %v2012_v53 }
0x1064   : > { %v2014_v54 = vmul.f32 %v2013_v60, %v2013_v60 }
0x1066   : > { %v2015_v51 = vsel %vm563_vm0, %v2014_v54, 0.0 }
0x1067   : > { %2016 = vadd.xlane.f32.xlu0 %v2015_v51 }
0x10da   : > { %v2017_v55 = vpop.xlane.xlu0 %2016 }
0x10db   : > { %v2018_v4 = vmul.f32 %v2017_v55, %v2849_v44  ;;  %v2530_v44 = vld [vmem:[%s3119_s16] ss:$0 sm:$0xff] }
0x10dd   : > { %v2019_v56 = vadd.f32 1e-05, %v2018_v4 }
0x10df   : > { %2577 = vrsqrt.f32 %v2019_v56  ;;  %vm2026_vm14 = vweird.f32 %v2019_v56 }
0x10e5   : > { %v2578_v52 = vpop.eup %2577 }
0x10e6   : > { %v2021_v57 = vmul.f32 %v2578_v52, %v2019_v56  ;;  %vm2027_vm9 = vweird.f32 %v2578_v52 }
0x10e7   : > { %vm2028_vm15 = vmor %vm2026_vm14, %vm2027_vm9 }
0x10e8   : > { %v2022_v13 = vmul.f32 %v2578_v52, %v2021_v57 }
0x10ea   : > { %v2023_v58 = vmul.f32 0.5, %v2022_v13 }
0x10ec   : > { %v2024_v49 = vsub.f32 1.5, %v2023_v58 }
0x10ee   : > { %v2025_v59 = vmul.f32 %v2578_v52, %v2024_v49 }
0x10f0   : > { %v2029_v62 = vsel %vm2028_vm15, %v2578_v52, %v2025_v59 }
0x10f1   : > { %v2030_v63 = vmul.f32 %v2029_v62, %v2013_v60 }
0x10f3   : > { %v2034_v1 = vmul.f32 %v2529_v61, %v2030_v63 }
0x10f5   : > { %v2038_v2 = vadd.f32 %v2530_v44, %v2034_v1 }
0x10f7   : > { %2039 = vst.msk [vmem:[%s543_s23] sm:$0xff] %vm563_vm0, %v2038_v2 }
0x10f8 PF: > { %s27_s24 = sadd.s32 1, %s2585_s24  }
0x10f9   : > { %p24_p4 = scmp.ge.s32.totalorder %s27_s24, 4  }
0x10fb   :  { %26 = sbr.rel (!%p24_p4) target bundleno = 3 (0x3), region = 139 }

</bundles_post_ra>
